<compile_context>
chip_gen: v7x
topology: tpu7x:2x2x1
jax: 0.10.0
libtpu: 0.0.40
codegen_flags: <defaults>
</compile_context>

<pallas_src>
import jax
import jax.numpy as jnp
from jax import lax
from jax.experimental import pallas as pl
from jax.experimental.pallas import tpu as pltpu

WIN = 128          # synthetic frame/window size for the feature extractor
N_MELS = 64        # "mel" bins
NB_FT = 64         # encoder.num_features
NUM_CLASSES = 2
KH = KW = 3        # conv stem kernel
STRIDE = 2
PAD = 1
GEM_P = 3.0        # GeM default p (p_trainable=False)
GEM_EPS = 1e-6

HO = (N_MELS + 2 * PAD - KH) // STRIDE + 1     # conv output rows over mel axis (32)
HOF = HO * NB_FT                               # 2048, lane-dense matmul width
KCAT = KW * N_MELS                             # 192, concatenated-K contraction depth
VMEM_LIMIT = 32 * 1024 * 1024                  # explicit scoped VMEM (safe on v5e/v6e/v7x)


def _round_up(v, m):
    return ((v + m - 1) // m) * m


# --------------------------- mel extraction kernel --------------------------

def _mel_kernel(f_ref, w_ref, o_ref):
    # frames [tm, WIN] @ mel_w [WIN, N_MELS] -> log(1 + |.|)
    # bf16 only on the MXU operands; elementwise stays f32 (v5e-safe).
    proj = jnp.dot(f_ref[...].astype(jnp.bfloat16), w_ref[...],
                   preferred_element_type=jnp.float32)
    o_ref[...] = jnp.log(jnp.abs(proj) + 1.0).astype(o_ref.dtype)


def mel_extract(frames, mel_w_bf16):
    M, K = frames.shape
    N = mel_w_bf16.shape[1]
    tm = min(1024, _round_up(M, 8))            # big tiles (~86% of HBM roofline), bounded VMEM
    return pl.pallas_call(
        _mel_kernel,
        out_shape=jax.ShapeDtypeStruct((M, N), jnp.bfloat16),
        grid=(pl.cdiv(M, tm),),                # ragged tail handled by Pallas masking
        in_specs=[pl.BlockSpec((tm, K), lambda i: (i, 0)),
                  pl.BlockSpec((K, N), lambda i: (0, 0))],
        out_specs=pl.BlockSpec((tm, N), lambda i: (i, 0)),
        compiler_params=pltpu.CompilerParams(
            dimension_semantics=("parallel",),
            vmem_limit_bytes=VMEM_LIMIT),
    )(frames, mel_w_bf16)


# ----------------- fused conv-stem + GeM + head: weight prep -----------------

def _prepare_conv_params(conv_w, conv_b, tc_is_odd):
    """Fold duplicated mel channels, express the 3x3/s2 conv along the mel axis
    as 3 banded [N_MELS, Ho*NB_FT] matrices (one per time tap kj) stacked into a
    single [3*N_MELS, Ho*NB_FT] contraction matrix, and fold the constant
    positional channel + conv bias into additive bias vectors."""
    w_mel = conv_w[:, 0] + conv_w[:, 1]                       # [F, KH, KW] (ch0==ch1 folded)
    w_pos = conv_w[:, 2]                                      # [F, KH, KW]

    h = jnp.arange(N_MELS)[:, None]                           # [64, 1]
    ho = jnp.arange(HO)[None, :]                              # [1, 32]
    ki = h - 2 * ho + 1                                       # which kernel row hits mel row h
    valid = (ki >= 0) & (ki < KH)
    kic = jnp.clip(ki, 0, KH - 1)
    w_t = jnp.transpose(w_mel, (2, 1, 0))                     # [kj, ki, F]
    wmat = jnp.where(valid[None, :, :, None], w_t[:, kic, :], 0.0)   # [kj, 64, HO, F]
    # concat the three taps along K (rows) -> one [192, 2048] MXU operand
    wcat = wmat.reshape(KCAT, HOF).astype(jnp.bfloat16)

    # positional channel value depends only on the mel row -> per-(ho, f) bias.
    r = 2 * jnp.arange(HO)[:, None] + jnp.arange(KH)[None, :] - 1    # [HO, ki]
    posr = jnp.where((r >= 0) & (r < N_MELS),
                     r.astype(jnp.float32) / (N_MELS - 1.0), 0.0)
    pvec = jnp.einsum("hk,fkj->jhf", posr, w_pos).reshape(KW, HOF)   # [kj, HOF]

    base = pvec[0] + pvec[1] + pvec[2] + jnp.tile(conv_b, HO)        # interior columns
    corr_first = pvec[0]                                             # kj=0 tap is pad at wo == 0
    corr_last = pvec[2] if tc_is_odd else jnp.zeros_like(pvec[2])    # kj=2 pad at last wo (odd T)
    bias_arr = jnp.stack([base, corr_first, corr_last], axis=0)      # [3, HOF] f32
    return wcat, bias_arr


# ------------------- fused conv-stem + GeM + head kernel ---------------------

def conv_gem_head(rcat, wcat, bias_arr, fc_w, fc_b, *, B, NC, NWO, WT, Wo):
    inv_count = 1.0 / float(HO * Wo * NC)      # GeM averages over the chunk-merged map
    wo_last = Wo - 1

    def kernel(r_ref, w_ref, b_ref, fcw_ref, fcb_ref, o_ref, acc_ref):
        c = pl.program_id(1)
        t = pl.program_id(2)

        @pl.when((c == 0) & (t == 0))
        def _init():
            acc_ref[...] = jnp.zeros_like(acc_ref)

        # 3x3 stride-2 conv for this time tile as ONE lane-dense (N = 2048)
        # matmul over the concatenated taps: [WT, 192] @ [192, 2048].
        # Operands bf16, accumulation f32.  No im2col, no feature-map HBM.
        conv = jnp.dot(r_ref[0], w_ref[...], preferred_element_type=jnp.float32)

        wo_idx = t * WT + lax.broadcasted_iota(jnp.int32, (WT, 1), 0)
        bias = (b_ref[0:1, :]
                - jnp.where(wo_idx == 0, 1.0, 0.0) * b_ref[1:2, :]
                - jnp.where(wo_idx == wo_last, 1.0, 0.0) * b_ref[2:3, :])
        xc = jnp.maximum(conv + bias, GEM_EPS)        # ReLU fused with GeM clamp(min=eps)
        x3 = xc * xc * xc                             # x^p, p = 3
        x3 = jnp.where(wo_idx < Wo, x3, 0.0)          # mask padded time columns
        acc_ref[...] += jnp.sum(x3, axis=0, keepdims=True)

        @pl.when((c == NC - 1) & (t == NWO - 1))
        def _finalize():
            # reduce the (ho-major, feature-minor) accumulator over ho
            tot = acc_ref[0:1, 0:NB_FT]
            for hh in range(1, HO):
                tot = tot + acc_ref[0:1, hh * NB_FT:(hh + 1) * NB_FT]
            mp = tot * inv_count                                  # mean of x^p
            pooled = jnp.exp(jnp.log(mp) * (1.0 / GEM_P))         # ^(1/p)   [1, NB_FT]
            logits = jnp.dot(pooled, fcw_ref[...],
                             preferred_element_type=jnp.float32) + fcb_ref[...]
            o_ref[...] = logits.reshape(1, 1, NUM_CLASSES)

    out = pl.pallas_call(
        kernel,
        out_shape=jax.ShapeDtypeStruct((B, 1, NUM_CLASSES), jnp.float32),
        grid=(B, NC, NWO),
        in_specs=[
            pl.BlockSpec((1, WT, KCAT), lambda b, c, t: (b * NC + c, t, 0)),
            pl.BlockSpec((KCAT, HOF), lambda b, c, t: (0, 0)),
            pl.BlockSpec((3, HOF), lambda b, c, t: (0, 0)),
            pl.BlockSpec((NB_FT, NUM_CLASSES), lambda b, c, t: (0, 0)),
            pl.BlockSpec((1, NUM_CLASSES), lambda b, c, t: (0, 0)),
        ],
        out_specs=pl.BlockSpec((1, 1, NUM_CLASSES), lambda b, c, t: (b, 0, 0)),
        scratch_shapes=[pltpu.VMEM((1, HOF), jnp.float32)],
        compiler_params=pltpu.CompilerParams(
            dimension_semantics=("parallel", "arbitrary", "arbitrary"),
            vmem_limit_bytes=VMEM_LIMIT),
    )(rcat, wcat, bias_arr, fc_w, fc_b)
    return out.reshape(B, NUM_CLASSES)


# --------------------------- Forward (glue) ----------------------------------

def cls_model_forward(x, params, y=None, y_aux=None, w=None):
    B, L = x.shape
    n_chunks = L // (32000 * 5)                 # static under jit
    NC = n_chunks if n_chunks > 1 else 1

    # ft_extractor: frame + learned projection + log compression (Pallas matmul)
    # TODO(synk): real ft_extractor computes an STFT mel-spectrogram; approximated
    # here by a framed learned projection with log compression.
    T = L // WIN
    Tc = T // NC
    T_used = NC * Tc                            # == reference time crop for chunking
    frames = x[:, :T_used * WIN].reshape(B * T_used, WIN)
    mel = mel_extract(frames, params["mel_w"].astype(jnp.bfloat16))    # [B*T, 64] bf16
    mel = mel.reshape(B * NC, Tc, N_MELS)       # time-major, mel (=conv K dim) on lanes

    # even/odd time-phase split (space-to-depth for the stride-2 conv); the three
    # column taps (kj = 0/1/2) are concatenated on lanes -> single K=192 matmul.
    Wo = (Tc + 2 * PAD - KW) // STRIDE + 1
    meven = mel[:, 0::2, :]                                    # [B*NC, Wo, 64]
    modd = mel[:, 1::2, :]
    if modd.shape[1] < Wo:                                     # odd Tc -> trailing pad column
        modd = jnp.pad(modd, ((0, 0), (0, 1), (0, 0)))
    r0 = jnp.concatenate([jnp.zeros_like(modd[:, :1]), modd[:, :-1]], axis=1)
    rcat = jnp.concatenate([r0, meven, modd], axis=-1)         # [B*NC, Wo, 192] bf16

    WT = min(256, _round_up(Wo, 8))             # time tile: bounds VMEM (v7x) + pipelining
    Wo_pad = _round_up(Wo, WT)
    NWO = Wo_pad // WT
    if Wo_pad > Wo:
        rcat = jnp.pad(rcat, ((0, 0), (0, Wo_pad - Wo), (0, 0)))

    # encoder (synthetic): conv stem 3x3/s2 + ReLU producing NB_FT feature maps,
    # fused with GeM pooling (+Identity dropout, drop_rate=0) and the Linear head.
    # TODO(synk): full timm backbone not reproduced; single conv stem stands in.
    wcat, bias_arr = _prepare_conv_params(params["conv_w"], params["conv_b"],
                                          tc_is_odd=(Tc % 2 == 1))
    logits = conv_gem_head(rcat, wcat, bias_arr, params["fc_w"], params["fc_b"],
                           B=B, NC=NC, NWO=NWO, WT=WT, Wo=Wo)
    return logits, y, y_aux, w


def init_params(key):
    k1, k2, k3, k4 = jax.random.split(key, 4)
    return {
        "mel_w": jax.random.normal(k1, (WIN, N_MELS), jnp.float32) / jnp.sqrt(float(WIN)),
        "conv_w": jax.random.normal(k2, (NB_FT, 3, KH, KW), jnp.float32) * 0.1,
        "conv_b": jnp.zeros((NB_FT,), jnp.float32),
        "fc_w": jax.random.normal(k3, (NB_FT, NUM_CLASSES), jnp.float32) * 0.05,
        "fc_b": jax.random.normal(k4, (1, NUM_CLASSES), jnp.float32) * 0.01,
    }


if __name__ == "__main__":
    key = jax.random.PRNGKey(0)
    kx, kp = jax.random.split(key)

    B = 2
    L = WIN * 64                    # -> mel image [64, 64] per sample, n_chunks = 0
    x = jax.random.normal(kx, (B, L), jnp.float32)
    params = init_params(kp)

    logits, y, y_aux, w = jax.jit(cls_model_forward)(x, params)
    jax.block_until_ready(logits)
    assert logits.shape == (B, NUM_CLASSES)
    print("KERNEL_OK")
</pallas_src>

<mosaic_0001>
module attributes {stable_mosaic.version = 11 : i64} {
  func.func @_mel_kernel(%arg0: i32, %arg1: memref<128x128xf32, #tpu.memory_space<vmem>>, %arg2: memref<128x64xbf16, #tpu.memory_space<vmem>>, %arg3: memref<128x64xbf16, #tpu.memory_space<vmem>>) attributes {dimension_semantics = [#tpu.dimension_semantics<parallel>], iteration_bounds = array<i64: 1>, scalar_prefetch = 0 : i64, scratch_operands = 0 : i64, tpu.core_type = #tpu.core_type<tc>, window_params = [{transform_indices = @transform_0, window_bounds = array<i64: 128, 128>}, {pipeline_mode = #tpu.pipeline_mode<synchronous>, transform_indices = @transform_1, window_bounds = array<i64: 128, 64>}, {transform_indices = @transform_2, window_bounds = array<i64: 128, 64>}]} {
    %c0 = arith.constant 0 : index
    %c0_0 = arith.constant 0 : index
    %0 = vector.load %arg1[%c0, %c0_0] : memref<128x128xf32, #tpu.memory_space<vmem>>, vector<128x128xf32>
    %1 = arith.truncf %0 : vector<128x128xf32> to vector<128x128xbf16>
    %c0_1 = arith.constant 0 : index
    %c0_2 = arith.constant 0 : index
    %2 = vector.load %arg2[%c0_1, %c0_2] : memref<128x64xbf16, #tpu.memory_space<vmem>>, vector<128x64xbf16>
    %cst = arith.constant dense<0.000000e+00> : vector<128x64xf32>
    %3 = tpu.matmul %1, %2, %cst {dimension_numbers = #tpu.dot_dimension_numbers<[1], [0], [0], [1], [0, 0, 1, 1], [], []>} : vector<128x128xbf16>, vector<128x64xbf16>, vector<128x64xf32> -> vector<128x64xf32>
    %4 = math.absf %3 : vector<128x64xf32>
    %cst_3 = arith.constant 1.000000e+00 : f32
    %5 = vector.broadcast %cst_3 : f32 to vector<128x64xf32>
    %6 = arith.addf %4, %5 : vector<128x64xf32>
    %7 = math.log %6 : vector<128x64xf32>
    %8 = arith.truncf %7 : vector<128x64xf32> to vector<128x64xbf16>
    %c0_4 = arith.constant 0 : index
    %c0_5 = arith.constant 0 : index
    %9 = vector.load %arg3[%c0_4, %c0_5] : memref<128x64xbf16, #tpu.memory_space<vmem>>, vector<128x64xbf16>
    tpu.vector_store %arg3[%c0_4, %c0_5], %8 {strides = array<i32>} : memref<128x64xbf16, #tpu.memory_space<vmem>>, vector<128x64xbf16>,
    return
  }
  func.func @transform_0(%arg0: i32) -> (i32, i32) {
    %c0_i32 = arith.constant 0 : i32
    %c0_i32_0 = arith.constant 0 : i32
    return %arg0, %c0_i32 : i32, i32
  }
  func.func @transform_1(%arg0: i32) -> (i32, i32) {
    %c0_i32 = arith.constant 0 : i32
    %c0_i32_0 = arith.constant 0 : i32
    %c0_i32_1 = arith.constant 0 : i32
    return %c0_i32, %c0_i32_0 : i32, i32
  }
  func.func @transform_2(%arg0: i32) -> (i32, i32) {
    %c0_i32 = arith.constant 0 : i32
    %c0_i32_0 = arith.constant 0 : i32
    return %arg0, %c0_i32 : i32, i32
  }
}

module attributes {stable_mosaic.version = 11 : i64} {
  func.func @kernel(%arg0: i32, %arg1: i32, %arg2: i32, %arg3: memref<1x32x192xbf16, #tpu.memory_space<vmem>>, %arg4: memref<192x2048xbf16, #tpu.memory_space<vmem>>, %arg5: memref<3x2048xf32, #tpu.memory_space<vmem>>, %arg6: memref<64x2xf32, #tpu.memory_space<vmem>>, %arg7: memref<1x2xf32, #tpu.memory_space<vmem>>, %arg8: memref<1x1x2xf32, #tpu.memory_space<vmem>>, %arg9: memref<1x2048xf32, #tpu.memory_space<vmem>>) attributes {dimension_semantics = [#tpu.dimension_semantics<parallel>, #tpu.dimension_semantics<arbitrary>, #tpu.dimension_semantics<arbitrary>], iteration_bounds = array<i64: 2, 1, 1>, scalar_prefetch = 0 : i64, scratch_operands = 1 : i64, tpu.core_type = #tpu.core_type<tc>, window_params = [{transform_indices = @transform_0, window_bounds = array<i64: 1, 32, 192>}, {pipeline_mode = #tpu.pipeline_mode<synchronous>, transform_indices = @transform_1, window_bounds = array<i64: 192, 2048>}, {pipeline_mode = #tpu.pipeline_mode<synchronous>, transform_indices = @transform_2, window_bounds = array<i64: 3, 2048>}, {pipeline_mode = #tpu.pipeline_mode<synchronous>, transform_indices = @transform_3, window_bounds = array<i64: 64, 2>}, {pipeline_mode = #tpu.pipeline_mode<synchronous>, transform_indices = @transform_4, window_bounds = array<i64: 1, 2>}, {transform_indices = @transform_5, window_bounds = array<i64: 1, 1, 2>}]} {
    %c0_i32 = arith.constant 0 : i32
    %0 = arith.cmpi eq, %arg1, %c0_i32 : i32
    %c0_i32_0 = arith.constant 0 : i32
    %1 = arith.cmpi eq, %arg2, %c0_i32_0 : i32
    %2 = arith.andi %0, %1 : i1
    %3 = arith.extui %2 : i1 to i32
    %c0_i32_1 = arith.constant 0 : i32
    %4 = arith.cmpi ne, %3, %c0_i32_1 : i32
    scf.if %4 {
      %cst_26 = arith.constant 0.000000e+00 : f32
      %56 = vector.broadcast %cst_26 : f32 to vector<1x2048xf32>
      %c0_27 = arith.constant 0 : index
      %c0_28 = arith.constant 0 : index
      %57 = vector.load %arg9[%c0_27, %c0_28] : memref<1x2048xf32, #tpu.memory_space<vmem>>, vector<1x2048xf32>
      tpu.vector_store %arg9[%c0_27, %c0_28], %56 {strides = array<i32>} : memref<1x2048xf32, #tpu.memory_space<vmem>>, vector<1x2048xf32>,
    } else {
    }
    %c0 = arith.constant 0 : index
    %c0_2 = arith.constant 0 : index
    %c0_3 = arith.constant 0 : index
    %5 = vector.load %arg3[%c0, %c0_2, %c0_3] : memref<1x32x192xbf16, #tpu.memory_space<vmem>>, vector<1x32x192xbf16>
    %6 = vector.shape_cast %5 : vector<1x32x192xbf16> to vector<32x192xbf16>
    %c0_4 = arith.constant 0 : index
    %c0_5 = arith.constant 0 : index
    %7 = vector.load %arg4[%c0_4, %c0_5] : memref<192x2048xbf16, #tpu.memory_space<vmem>>, vector<192x2048xbf16>
    %cst = arith.constant dense<0.000000e+00> : vector<32x2048xf32>
    %8 = tpu.matmul %6, %7, %cst {dimension_numbers = #tpu.dot_dimension_numbers<[1], [0], [0], [1], [0, 0, 1, 1], [], []>} : vector<32x192xbf16>, vector<192x2048xbf16>, vector<32x2048xf32> -> vector<32x2048xf32>
    %c32_i32 = arith.constant 32 : i32
    %9 = arith.muli %arg2, %c32_i32 : i32
    %10 = tpu.iota {dimensions = array<i32: 0>} : vector<32x1xi32>
    %11 = vector.broadcast %9 : i32 to vector<32x1xi32>
    %12 = arith.addi %11, %10 : vector<32x1xi32>
    %c0_6 = arith.constant 0 : index
    %c0_7 = arith.constant 0 : index
    %13 = vector.load %arg5[%c0_6, %c0_7] : memref<3x2048xf32, #tpu.memory_space<vmem>>, vector<1x2048xf32>
    %c0_i32_8 = arith.constant 0 : i32
    %14 = vector.broadcast %c0_i32_8 : i32 to vector<32x1xi32>
    %15 = arith.cmpi eq, %12, %14 : vector<32x1xi32>
    %cst_9 = arith.constant 1.000000e+00 : f32
    %cst_10 = arith.constant 0.000000e+00 : f32
    %16 = vector.broadcast %cst_9 : f32 to vector<32x1xf32>
    %17 = vector.broadcast %cst_10 : f32 to vector<32x1xf32>
    %18 = arith.select %15, %16, %17 : vector<32x1xi1>, vector<32x1xf32>
    %c1 = arith.constant 1 : index
    %c0_11 = arith.constant 0 : index
    %19 = vector.load %arg5[%c1, %c0_11] : memref<3x2048xf32, #tpu.memory_space<vmem>>, vector<1x2048xf32>
    %20 = vector.broadcast %18 : vector<32x1xf32> to vector<32x2048xf32>
    %21 = vector.broadcast %19 : vector<1x2048xf32> to vector<32x2048xf32>
    %22 = arith.mulf %20, %21 : vector<32x2048xf32>
    %23 = vector.broadcast %13 : vector<1x2048xf32> to vector<32x2048xf32>
    %24 = arith.subf %23, %22 : vector<32x2048xf32>
    %c31_i32 = arith.constant 31 : i32
    %25 = vector.broadcast %c31_i32 : i32 to vector<32x1xi32>
    %26 = arith.cmpi eq, %12, %25 : vector<32x1xi32>
    %cst_12 = arith.constant 1.000000e+00 : f32
    %cst_13 = arith.constant 0.000000e+00 : f32
    %27 = vector.broadcast %cst_12 : f32 to vector<32x1xf32>
    %28 = vector.broadcast %cst_13 : f32 to vector<32x1xf32>
    %29 = arith.select %26, %27, %28 : vector<32x1xi1>, vector<32x1xf32>
    %c2 = arith.constant 2 : index
    %c0_14 = arith.constant 0 : index
    %30 = vector.load %arg5[%c2, %c0_14] : memref<3x2048xf32, #tpu.memory_space<vmem>>, vector<1x2048xf32>
    %31 = vector.broadcast %29 : vector<32x1xf32> to vector<32x2048xf32>
    %32 = vector.broadcast %30 : vector<1x2048xf32> to vector<32x2048xf32>
    %33 = arith.mulf %31, %32 : vector<32x2048xf32>
    %34 = arith.subf %24, %33 : vector<32x2048xf32>
    %35 = arith.addf %8, %34 : vector<32x2048xf32>
    %cst_15 = arith.constant 9.99999997E-7 : f32
    %36 = vector.broadcast %cst_15 : f32 to vector<32x2048xf32>
    %37 = arith.maximumf %35, %36 : vector<32x2048xf32>
    %38 = arith.mulf %37, %37 : vector<32x2048xf32>
    %39 = arith.mulf %38, %37 : vector<32x2048xf32>
    %c32_i32_16 = arith.constant 32 : i32
    %40 = vector.broadcast %c32_i32_16 : i32 to vector<32x1xi32>
    %41 = arith.cmpi slt, %12, %40 : vector<32x1xi32>
    %cst_17 = arith.constant 0.000000e+00 : f32
    %42 = vector.shape_cast %41 : vector<32x1xi1> to vector<32x1xi1>
    %43 = vector.broadcast %42 : vector<32x1xi1> to vector<32x2048xi1>
    %44 = vector.broadcast %cst_17 : f32 to vector<32x2048xf32>
    %45 = arith.select %43, %39, %44 : vector<32x2048xi1>, vector<32x2048xf32>
    %c0_18 = arith.constant 0 : index
    %c0_19 = arith.constant 0 : index
    %46 = vector.load %arg9[%c0_18, %c0_19] : memref<1x2048xf32, #tpu.memory_space<vmem>>, vector<1x2048xf32>
    %cst_20 = arith.constant dense<0.000000e+00> : vector<2048xf32>
    %47 = vector.multi_reduction <add>, %45, %cst_20 [0] : vector<32x2048xf32> to vector<2048xf32>
    %48 = vector.shape_cast %47 : vector<2048xf32> to vector<1x2048xf32>
    %49 = arith.addf %46, %48 : vector<1x2048xf32>
    %c0_21 = arith.constant 0 : index
    %c0_22 = arith.constant 0 : index
    %50 = vector.load %arg9[%c0_21, %c0_22] : memref<1x2048xf32, #tpu.memory_space<vmem>>, vector<1x2048xf32>
    tpu.vector_store %arg9[%c0_21, %c0_22], %49 {strides = array<i32>} : memref<1x2048xf32, #tpu.memory_space<vmem>>, vector<1x2048xf32>,
    %c0_i32_23 = arith.constant 0 : i32
    %51 = arith.cmpi eq, %arg1, %c0_i32_23 : i32
    %c0_i32_24 = arith.constant 0 : i32
    %52 = arith.cmpi eq, %arg2, %c0_i32_24 : i32
    %53 = arith.andi %51, %52 : i1
    %54 = arith.extui %53 : i1 to i32
    %c0_i32_25 = arith.constant 0 : i32
    %55 = arith.cmpi ne, %54, %c0_i32_25 : i32
    scf.if %55 {
      %c0_26 = arith.constant 0 : index
      %c0_27 = arith.constant 0 : index
      %56 = vector.load %arg9[%c0_26, %c0_27] : memref<1x2048xf32, #tpu.memory_space<vmem>>, vector<1x64xf32>
      %c0_28 = arith.constant 0 : index
      %c64 = arith.constant 64 : index
      %57 = vector.load %arg9[%c0_28, %c64] : memref<1x2048xf32, #tpu.memory_space<vmem>>, vector<1x64xf32>
      %58 = arith.addf %56, %57 : vector<1x64xf32>
      %c0_29 = arith.constant 0 : index
      %c128 = arith.constant 128 : index
      %59 = vector.load %arg9[%c0_29, %c128] : memref<1x2048xf32, #tpu.memory_space<vmem>>, vector<1x64xf32>
      %60 = arith.addf %58, %59 : vector<1x64xf32>
      %c0_30 = arith.constant 0 : index
      %c192 = arith.constant 192 : index
      %61 = vector.load %arg9[%c0_30, %c192] : memref<1x2048xf32, #tpu.memory_space<vmem>>, vector<1x64xf32>
      %62 = arith.addf %60, %61 : vector<1x64xf32>
      %c0_31 = arith.constant 0 : index
      %c256 = arith.constant 256 : index
      %63 = vector.load %arg9[%c0_31, %c256] : memref<1x2048xf32, #tpu.memory_space<vmem>>, vector<1x64xf32>
      %64 = arith.addf %62, %63 : vector<1x64xf32>
      %c0_32 = arith.constant 0 : index
      %c320 = arith.constant 320 : index
      %65 = vector.load %arg9[%c0_32, %c320] : memref<1x2048xf32, #tpu.memory_space<vmem>>, vector<1x64xf32>
      %66 = arith.addf %64, %65 : vector<1x64xf32>
      %c0_33 = arith.constant 0 : index
      %c384 = arith.constant 384 : index
      %67 = vector.load %arg9[%c0_33, %c384] : memref<1x2048xf32, #tpu.memory_space<vmem>>, vector<1x64xf32>
      %68 = arith.addf %66, %67 : vector<1x64xf32>
      %c0_34 = arith.constant 0 : index
      %c448 = arith.constant 448 : index
      %69 = vector.load %arg9[%c0_34, %c448] : memref<1x2048xf32, #tpu.memory_space<vmem>>, vector<1x64xf32>
      %70 = arith.addf %68, %69 : vector<1x64xf32>
      %c0_35 = arith.constant 0 : index
      %c512 = arith.constant 512 : index
      %71 = vector.load %arg9[%c0_35, %c512] : memref<1x2048xf32, #tpu.memory_space<vmem>>, vector<1x64xf32>
      %72 = arith.addf %70, %71 : vector<1x64xf32>
      %c0_36 = arith.constant 0 : index
      %c576 = arith.constant 576 : index
      %73 = vector.load %arg9[%c0_36, %c576] : memref<1x2048xf32, #tpu.memory_space<vmem>>, vector<1x64xf32>
      %74 = arith.addf %72, %73 : vector<1x64xf32>
      %c0_37 = arith.constant 0 : index
      %c640 = arith.constant 640 : index
      %75 = vector.load %arg9[%c0_37, %c640] : memref<1x2048xf32, #tpu.memory_space<vmem>>, vector<1x64xf32>
      %76 = arith.addf %74, %75 : vector<1x64xf32>
      %c0_38 = arith.constant 0 : index
      %c704 = arith.constant 704 : index
      %77 = vector.load %arg9[%c0_38, %c704] : memref<1x2048xf32, #tpu.memory_space<vmem>>, vector<1x64xf32>
      %78 = arith.addf %76, %77 : vector<1x64xf32>
      %c0_39 = arith.constant 0 : index
      %c768 = arith.constant 768 : index
      %79 = vector.load %arg9[%c0_39, %c768] : memref<1x2048xf32, #tpu.memory_space<vmem>>, vector<1x64xf32>
      %80 = arith.addf %78, %79 : vector<1x64xf32>
      %c0_40 = arith.constant 0 : index
      %c832 = arith.constant 832 : index
      %81 = vector.load %arg9[%c0_40, %c832] : memref<1x2048xf32, #tpu.memory_space<vmem>>, vector<1x64xf32>
      %82 = arith.addf %80, %81 : vector<1x64xf32>
      %c0_41 = arith.constant 0 : index
      %c896 = arith.constant 896 : index
      %83 = vector.load %arg9[%c0_41, %c896] : memref<1x2048xf32, #tpu.memory_space<vmem>>, vector<1x64xf32>
      %84 = arith.addf %82, %83 : vector<1x64xf32>
      %c0_42 = arith.constant 0 : index
      %c960 = arith.constant 960 : index
      %85 = vector.load %arg9[%c0_42, %c960] : memref<1x2048xf32, #tpu.memory_space<vmem>>, vector<1x64xf32>
      %86 = arith.addf %84, %85 : vector<1x64xf32>
      %c0_43 = arith.constant 0 : index
      %c1024 = arith.constant 1024 : index
      %87 = vector.load %arg9[%c0_43, %c1024] : memref<1x2048xf32, #tpu.memory_space<vmem>>, vector<1x64xf32>
      %88 = arith.addf %86, %87 : vector<1x64xf32>
      %c0_44 = arith.constant 0 : index
      %c1088 = arith.constant 1088 : index
      %89 = vector.load %arg9[%c0_44, %c1088] : memref<1x2048xf32, #tpu.memory_space<vmem>>, vector<1x64xf32>
      %90 = arith.addf %88, %89 : vector<1x64xf32>
      %c0_45 = arith.constant 0 : index
      %c1152 = arith.constant 1152 : index
      %91 = vector.load %arg9[%c0_45, %c1152] : memref<1x2048xf32, #tpu.memory_space<vmem>>, vector<1x64xf32>
      %92 = arith.addf %90, %91 : vector<1x64xf32>
      %c0_46 = arith.constant 0 : index
      %c1216 = arith.constant 1216 : index
      %93 = vector.load %arg9[%c0_46, %c1216] : memref<1x2048xf32, #tpu.memory_space<vmem>>, vector<1x64xf32>
      %94 = arith.addf %92, %93 : vector<1x64xf32>
      %c0_47 = arith.constant 0 : index
      %c1280 = arith.constant 1280 : index
      %95 = vector.load %arg9[%c0_47, %c1280] : memref<1x2048xf32, #tpu.memory_space<vmem>>, vector<1x64xf32>
      %96 = arith.addf %94, %95 : vector<1x64xf32>
      %c0_48 = arith.constant 0 : index
      %c1344 = arith.constant 1344 : index
      %97 = vector.load %arg9[%c0_48, %c1344] : memref<1x2048xf32, #tpu.memory_space<vmem>>, vector<1x64xf32>
      %98 = arith.addf %96, %97 : vector<1x64xf32>
      %c0_49 = arith.constant 0 : index
      %c1408 = arith.constant 1408 : index
      %99 = vector.load %arg9[%c0_49, %c1408] : memref<1x2048xf32, #tpu.memory_space<vmem>>, vector<1x64xf32>
      %100 = arith.addf %98, %99 : vector<1x64xf32>
      %c0_50 = arith.constant 0 : index
      %c1472 = arith.constant 1472 : index
      %101 = vector.load %arg9[%c0_50, %c1472] : memref<1x2048xf32, #tpu.memory_space<vmem>>, vector<1x64xf32>
      %102 = arith.addf %100, %101 : vector<1x64xf32>
      %c0_51 = arith.constant 0 : index
      %c1536 = arith.constant 1536 : index
      %103 = vector.load %arg9[%c0_51, %c1536] : memref<1x2048xf32, #tpu.memory_space<vmem>>, vector<1x64xf32>
      %104 = arith.addf %102, %103 : vector<1x64xf32>
      %c0_52 = arith.constant 0 : index
      %c1600 = arith.constant 1600 : index
      %105 = vector.load %arg9[%c0_52, %c1600] : memref<1x2048xf32, #tpu.memory_space<vmem>>, vector<1x64xf32>
      %106 = arith.addf %104, %105 : vector<1x64xf32>
      %c0_53 = arith.constant 0 : index
      %c1664 = arith.constant 1664 : index
      %107 = vector.load %arg9[%c0_53, %c1664] : memref<1x2048xf32, #tpu.memory_space<vmem>>, vector<1x64xf32>
      %108 = arith.addf %106, %107 : vector<1x64xf32>
      %c0_54 = arith.constant 0 : index
      %c1728 = arith.constant 1728 : index
      %109 = vector.load %arg9[%c0_54, %c1728] : memref<1x2048xf32, #tpu.memory_space<vmem>>, vector<1x64xf32>
      %110 = arith.addf %108, %109 : vector<1x64xf32>
      %c0_55 = arith.constant 0 : index
      %c1792 = arith.constant 1792 : index
      %111 = vector.load %arg9[%c0_55, %c1792] : memref<1x2048xf32, #tpu.memory_space<vmem>>, vector<1x64xf32>
      %112 = arith.addf %110, %111 : vector<1x64xf32>
      %c0_56 = arith.constant 0 : index
      %c1856 = arith.constant 1856 : index
      %113 = vector.load %arg9[%c0_56, %c1856] : memref<1x2048xf32, #tpu.memory_space<vmem>>, vector<1x64xf32>
      %114 = arith.addf %112, %113 : vector<1x64xf32>
      %c0_57 = arith.constant 0 : index
      %c1920 = arith.constant 1920 : index
      %115 = vector.load %arg9[%c0_57, %c1920] : memref<1x2048xf32, #tpu.memory_space<vmem>>, vector<1x64xf32>
      %116 = arith.addf %114, %115 : vector<1x64xf32>
      %c0_58 = arith.constant 0 : index
      %c1984 = arith.constant 1984 : index
      %117 = vector.load %arg9[%c0_58, %c1984] : memref<1x2048xf32, #tpu.memory_space<vmem>>, vector<1x64xf32>
      %118 = arith.addf %116, %117 : vector<1x64xf32>
      %cst_59 = arith.constant 9.765625E-4 : f32
      %119 = vector.broadcast %cst_59 : f32 to vector<1x64xf32>
      %120 = arith.mulf %118, %119 : vector<1x64xf32>
      %121 = math.log %120 : vector<1x64xf32>
      %cst_60 = arith.constant 0.333333343 : f32
      %122 = vector.broadcast %cst_60 : f32 to vector<1x64xf32>
      %123 = arith.mulf %121, %122 : vector<1x64xf32>
      %124 = math.exp %123 : vector<1x64xf32>
      %c0_61 = arith.constant 0 : index
      %c0_62 = arith.constant 0 : index
      %125 = vector.load %arg6[%c0_61, %c0_62] : memref<64x2xf32, #tpu.memory_space<vmem>>, vector<64x2xf32>
      %cst_63 = arith.constant dense<0.000000e+00> : vector<1x2xf32>
      %126 = tpu.matmul %124, %125, %cst_63 {dimension_numbers = #tpu.dot_dimension_numbers<[1], [0], [0], [1], [0, 0, 1, 1], [], []>} : vector<1x64xf32>, vector<64x2xf32>, vector<1x2xf32> -> vector<1x2xf32>
      %c0_64 = arith.constant 0 : index
      %c0_65 = arith.constant 0 : index
      %127 = vector.load %arg7[%c0_64, %c0_65] : memref<1x2xf32, #tpu.memory_space<vmem>>, vector<1x2xf32>
      %128 = arith.addf %126, %127 : vector<1x2xf32>
      %129 = vector.shape_cast %128 : vector<1x2xf32> to vector<1x1x2xf32>
      %c0_66 = arith.constant 0 : index
      %c0_67 = arith.constant 0 : index
      %c0_68 = arith.constant 0 : index
      %130 = vector.load %arg8[%c0_66, %c0_67, %c0_68] : memref<1x1x2xf32, #tpu.memory_space<vmem>>, vector<1x1x2xf32>
      tpu.vector_store %arg8[%c0_66, %c0_67, %c0_68], %129 {strides = array<i32>} : memref<1x1x2xf32, #tpu.memory_space<vmem>>, vector<1x1x2xf32>,
    } else {
    }
    return
  }
  func.func @transform_0(%arg0: i32, %arg1: i32, %arg2: i32) -> (i32, i32, i32) {
    %c1_i32 = arith.constant 1 : i32
    %0 = arith.muli %arg0, %c1_i32 : i32
    %1 = arith.addi %0, %arg1 : i32
    %c0_i32 = arith.constant 0 : i32
    %c0_i32_0 = arith.constant 0 : i32
    return %1, %arg2, %c0_i32 : i32, i32, i32
  }
  func.func @transform_1(%arg0: i32, %arg1: i32, %arg2: i32) -> (i32, i32) {
    %c0_i32 = arith.constant 0 : i32
    %c0_i32_0 = arith.constant 0 : i32
    %c0_i32_1 = arith.constant 0 : i32
    return %c0_i32, %c0_i32_0 : i32, i32
  }
  func.func @transform_2(%arg0: i32, %arg1: i32, %arg2: i32) -> (i32, i32) {
    %c0_i32 = arith.constant 0 : i32
    %c0_i32_0 = arith.constant 0 : i32
    %c0_i32_1 = arith.constant 0 : i32
    return %c0_i32, %c0_i32_0 : i32, i32
  }
  func.func @transform_3(%arg0: i32, %arg1: i32, %arg2: i32) -> (i32, i32) {
    %c0_i32 = arith.constant 0 : i32
    %c0_i32_0 = arith.constant 0 : i32
    %c0_i32_1 = arith.constant 0 : i32
    return %c0_i32, %c0_i32_0 : i32, i32
  }
  func.func @transform_4(%arg0: i32, %arg1: i32, %arg2: i32) -> (i32, i32) {
    %c0_i32 = arith.constant 0 : i32
    %c0_i32_0 = arith.constant 0 : i32
    %c0_i32_1 = arith.constant 0 : i32
    return %c0_i32, %c0_i32_0 : i32, i32
  }
  func.func @transform_5(%arg0: i32, %arg1: i32, %arg2: i32) -> (i32, i32, i32) {
    %c0_i32 = arith.constant 0 : i32
    %c0_i32_0 = arith.constant 0 : i32
    %c0_i32_1 = arith.constant 0 : i32
    return %arg0, %c0_i32, %c0_i32_0 : i32, i32, i32
  }
}

</mosaic_0001>

<bundles_post_ra>
// kernel: tile.8
= control target key start
LH: loop header
LB: loop body
LE: loop exit
PB: predicated region body
PF: predicated region fallthrough
CT: control target
= control target key end

     0   :  { %2 = vsyncpa [#allocation1], 0  ;;  %s53_s6 = smov [#allocation0]   ;;  %s88_s0 = inlined_call_operand.hbm [shape: f32[64], index: 0, kind: input, shape index: {}]   ;;  %s89_s1 = inlined_call_operand.vmem [shape: f32[32,64], index: 1, kind: output, shape index: {}]  }
   0x1   :  { %s9_s7 = sshll.u32 %s53_s6, 4  ;;  %s29_s10 = scalar_lea.hbm %s88_s0, 16  ;;  %s10_s7 = int_to_ptr.vmem [resolvable:$true] %s9_s7 }
   0x2   :  { %p30_p0 = scmp.ne.s32.totalorder %s88_s0, %s29_s10  ;;  %p33_p1 = scmp.lt.u32.totalorder %s29_s10, %s88_s0 }
   0x4   :  { %p35_p2 = pnand %p33_p1, %p30_p0 }
   0x6   :  { %38 = shalt.err (!%p35_p2)
}
   0x7   :  { %s39_s15 = scalar_lea.vmem %s10_s7, 16  ;;  %s43_s16 = scalar_lea.vmem %s10_s7, 32 }
   0x8   :  { %p40_p3 = scmp.ne.s32.totalorder %s10_s7, %s39_s15  ;;  %p44_p4 = scmp.lt.s32.totalorder %s10_s7, %s10_s7 }
   0x9   :  { %p45_p5 = scmp.lt.s32.totalorder %s43_s16, %s39_s15 }
   0xb   :  { %p46_p6 = por %p45_p5, %p44_p4 }
   0xd   :  { %p47_p7 = pnand %p46_p6, %p40_p3 }
   0xf   :  { %50 = shalt.err (!%p47_p7)
}
  0x10   :  { %12 = dma.hbm_to_vmem [thread:$0]  %s88_s0, 16, %s10_s7, [#allocation1]  }
  0x11   :  { %51 = dma.done.wait [#allocation1], 16  }
  0x12   :  { %52 = vsyncadd [#allocation1], 4294967280  ;;  %v16_v0 = vld [vmem:[#allocation0] ss:$0 sm:$0xff] }
  0x13   :  { %17 = vst [vmem:[%s89_s1] sm:$0xff] %v16_v0  ;;  %25 = vst [vmem:[%s89_s1 + $0x8] sm:$0xff] %v16_v0 }
  0x14   :  { %26 = vst [vmem:[%s89_s1 + $0x10] sm:$0xff] %v16_v0  ;;  %27 = vst [vmem:[%s89_s1 + $0x18] sm:$0xff] %v16_v0 }
  0x15   :  { %24 = vsyncpa [#allocation1], 1 }

// kernel: cls_model_forward.2
= control target key start
LH: loop header
LB: loop body
LE: loop exit
PB: predicated region body
PF: predicated region fallthrough
CT: control target
= control target key end

     0   :  { %vm325_vm0 = vcmask 519168   ;;  %s641_s1 = inlined_call_operand.vmem [shape: bf16[128,64], index: 1, kind: input, shape index: {}]   ;;  %s642_s0 = inlined_call_operand.vmem [shape: f32[128,128], index: 0, kind: input, shape index: {}]   ;;  %s643_s2 = inlined_call_operand.vmem [shape: bf16[128,64], index: 2, kind: output, shape index: {}]  }
   0x1   :  { %v450_v0 = vld [vmem:[%s641_s1] sm:$0xff]   ;;  %v451_v1 = vld [vmem:[%s641_s1 + $0x8] sm:$0xff]   ;;  %v452_v2 = vld [vmem:[%s641_s1 + $0x10] sm:$0xff]  }
   0x2   :  { %402 = vmatprep.subr.bf16.mxu0 %v450_v0  ;;  %434 = vmatprep.subr.bf16.mxu1 %v450_v0  ;;  %v453_v3 = vld [vmem:[%s641_s1 + $0x18] sm:$0xff]   ;;  %v12_v4 = vld [vmem:[%s642_s0] sm:$0xff]  ;;  %v13_v5 = vld [vmem:[%s642_s0 + $0x8] sm:$0xff] }
   0x3   :  { %403 = vmatpush3.bf16.msra.mxu0 %v450_v0  ;;  %442 = vmatpush3.bf16.msra.mxu1 %v450_v0  ;;  %v20_v6 = vld [vmem:[%s642_s0 + $0x40] sm:$0xff]  ;;  %v28_v7 = vpack.c.bf16 %v13_v5, %v12_v4  ;;  %v21_v8 = vld [vmem:[%s642_s0 + $0x48] sm:$0xff]  ;;  %v456_v12 = vld [vmem:[%s641_s1 + $0x30] sm:$0xff]  }
   0x4   :  { %404 = vmatprep.subr.bf16.mxu0 %v451_v1  ;;  %435 = vmatprep.subr.bf16.mxu1 %v451_v1  ;;  %v32_v9 = vpack.c.bf16 %v21_v8, %v20_v6  ;;  %v454_v10 = vld [vmem:[%s641_s1 + $0x20] sm:$0xff]   ;;  %v455_v11 = vld [vmem:[%s641_s1 + $0x28] sm:$0xff]   ;;  %v457_v13 = vld [vmem:[%s641_s1 + $0x38] sm:$0xff]  }
   0x5   :  { %418 = vmatprep.mubr.bf16.mxu0 %v28_v7  ;;  %v14_v14 = vld [vmem:[%s642_s0 + $0x10] sm:$0xff]  ;;  %v15_v15 = vld [vmem:[%s642_s0 + $0x18] sm:$0xff]  ;;  %v16_v18 = vld [vmem:[%s642_s0 + $0x20] sm:$0xff] }
   0x6   :  { %426 = vmatprep.mubr.bf16.mxu1 %v32_v9  ;;  %v22_v16 = vld [vmem:[%s642_s0 + $0x50] sm:$0xff]  ;;  %v23_v17 = vld [vmem:[%s642_s0 + $0x58] sm:$0xff]  ;;  %v17_v19 = vld [vmem:[%s642_s0 + $0x28] sm:$0xff]  ;;  %v29_v22 = vpack.c.bf16 %v15_v15, %v14_v14 }
   0x7   :  { %405 = vmatpush3.bf16.msra.mxu0 %v451_v1  ;;  %443 = vmatpush3.bf16.msra.mxu1 %v451_v1  ;;  %v24_v20 = vld [vmem:[%s642_s0 + $0x60] sm:$0xff]  ;;  %v25_v21 = vld [vmem:[%s642_s0 + $0x68] sm:$0xff]  ;;  %v33_v23 = vpack.c.bf16 %v23_v17, %v22_v16  ;;  %v30_v24 = vpack.c.bf16 %v17_v19, %v16_v18  ;;  %v18_v26 = vld [vmem:[%s642_s0 + $0x30] sm:$0xff] }
   0x8   :  { %406 = vmatprep.subr.bf16.mxu0 %v452_v2  ;;  %436 = vmatprep.subr.bf16.mxu1 %v452_v2  ;;  %v34_v25 = vpack.c.bf16 %v25_v21, %v24_v20  ;;  %v19_v27 = vld [vmem:[%s642_s0 + $0x38] sm:$0xff]  ;;  %v26_v28 = vld [vmem:[%s642_s0 + $0x70] sm:$0xff] }
   0x9   :  { %v27_v29 = vld [vmem:[%s642_s0 + $0x78] sm:$0xff]  ;;  %v31_v30 = vpack.c.bf16 %v19_v27, %v18_v26 }
   0xa   :  { %v35_v31 = vpack.c.bf16 %v27_v29, %v26_v28 }
   0xb   :  { %407 = vmatpush3.bf16.msra.mxu0 %v452_v2  ;;  %444 = vmatpush3.bf16.msra.mxu1 %v452_v2 }
   0xc   :  { %408 = vmatprep.subr.bf16.mxu0 %v453_v3  ;;  %437 = vmatprep.subr.bf16.mxu1 %v453_v3 }
   0xf   :  { %409 = vmatpush3.bf16.msra.mxu0 %v453_v3  ;;  %445 = vmatpush3.bf16.msra.mxu1 %v453_v3 }
  0x10   :  { %410 = vmatprep.subr.bf16.mxu0 %v454_v10  ;;  %438 = vmatprep.subr.bf16.mxu1 %v454_v10 }
  0x13   :  { %411 = vmatpush3.bf16.msra.mxu0 %v454_v10  ;;  %446 = vmatpush3.bf16.msra.mxu1 %v454_v10 }
  0x14   :  { %412 = vmatprep.subr.bf16.mxu0 %v455_v11  ;;  %439 = vmatprep.subr.bf16.mxu1 %v455_v11 }
  0x17   :  { %413 = vmatpush3.bf16.msra.mxu0 %v455_v11  ;;  %447 = vmatpush3.bf16.msra.mxu1 %v455_v11 }
  0x18   :  { %414 = vmatprep.subr.bf16.mxu0 %v456_v12  ;;  %440 = vmatprep.subr.bf16.mxu1 %v456_v12 }
  0x1b   :  { %415 = vmatpush3.bf16.msra.mxu0 %v456_v12  ;;  %448 = vmatpush3.bf16.msra.mxu1 %v456_v12 }
  0x1c   :  { %416 = vmatprep.subr.bf16.mxu0 %v457_v13  ;;  %441 = vmatprep.subr.bf16.mxu1 %v457_v13 }
  0x1f   :  { %417 = vmatpush3.bf16.msra.mxu0 %v457_v13  ;;  %449 = vmatpush3.bf16.msra.mxu1 %v457_v13 }
  0x22   :  { %419 = vmatmul.mubr.bf16.vlgmr.msra.gmra.mrb[0].mxu0 %v29_v22  ;;  %427 = vmatmul.mubr.bf16.vlgmr.msra.gmra.mrb[0].mxu1 %v33_v23 }
  0x23   :  { %422 = vmatprep.mubr.bf16.mxu0 %v30_v24  ;;  %430 = vmatprep.mubr.bf16.mxu1 %v34_v25 }
  0x2a   :  { %423 = vmatmul.mubr.bf16.gmra.mrb[4].mxu0 %v31_v30  ;;  %431 = vmatmul.mubr.bf16.gmra.mrb[4].mxu1 %v35_v31 }
  0xf5   :  { %v420_v32 = vpop.f32.mrb[0].mxu0  ;;  %v428_v33 = vpop.f32.mrb[0].mxu1 }
  0xf6   :  { %v199_v34 = vand.u32 2147483647, %v420_v32  ;;  %v207_v35 = vand.u32 2147483647, %v428_v33  ;;  %v134_v36 = vpop.f32.mrb[1].mxu0  ;;  %v166_v37 = vpop.f32.mrb[1].mxu1 }
  0xf7   :  { %v197_v38 = vand.u32 2147483647, %v134_v36  ;;  %v205_v39 = vand.u32 2147483647, %v166_v37  ;;  %v421_v40 = vpop.f32.mrb[2].mxu0  ;;  %v429_v41 = vpop.f32.mrb[2].mxu1 }
  0xf8   :  { %v215_v42 = vadd.f32 1.0, %v199_v34  ;;  %v223_v43 = vadd.f32 1.0, %v207_v35  ;;  %v200_v44 = vand.u32 2147483647, %v421_v40  ;;  %v208_v45 = vand.u32 2147483647, %v429_v41 }
  0xf9   :  { %v213_v46 = vadd.f32 1.0, %v197_v38  ;;  %v221_v47 = vadd.f32 1.0, %v205_v39  ;;  %v137_v48 = vpop.f32.mrb[3].mxu0  ;;  %v169_v49 = vpop.f32.mrb[3].mxu1 }
  0xfa   :  { %458 = vlog2.f32 %v215_v42  ;;  %v216_v50 = vadd.f32 1.0, %v200_v44  ;;  %v198_v51 = vand.u32 2147483647, %v137_v48  ;;  %v224_v52 = vadd.f32 1.0, %v208_v45 }
  0xfb   :  { %460 = vlog2.f32 %v223_v43  ;;  %v206_v53 = vand.u32 2147483647, %v169_v49 }
  0xfc   :  { %462 = vlog2.f32 %v213_v46  ;;  %v214_v54 = vadd.f32 1.0, %v198_v51 }
  0xfd   :  { %464 = vlog2.f32 %v221_v47  ;;  %v222_v55 = vadd.f32 1.0, %v206_v53  ;;  %v424_v56 = vpop.f32.mrb[4].mxu0  ;;  %v432_v57 = vpop.f32.mrb[4].mxu1 }
  0xfe   :  { %466 = vlog2.f32 %v216_v50  ;;  %v203_v58 = vand.u32 2147483647, %v424_v56  ;;  %v211_v59 = vand.u32 2147483647, %v432_v57  ;;  %v150_v60 = vpop.f32.mrb[5].mxu0  ;;  %v182_v61 = vpop.f32.mrb[5].mxu1 }
  0xff   :  { %468 = vlog2.f32 %v224_v52  ;;  %v201_v62 = vand.u32 2147483647, %v150_v60  ;;  %v209_v63 = vand.u32 2147483647, %v182_v61  ;;  %v425_v0 = vpop.f32.mrb[6].mxu0  ;;  %v433_v1 = vpop.f32.mrb[6].mxu1 }
 0x100   :  { %470 = vlog2.f32 %v214_v54  ;;  %v219_v2 = vadd.f32 1.0, %v203_v58  ;;  %v227_v3 = vadd.f32 1.0, %v211_v59  ;;  %v204_v4 = vand.u32 2147483647, %v425_v0  ;;  %v153_v5 = vpop.f32.mrb[7].mxu0  ;;  %v185_v6 = vpop.f32.mrb[7].mxu1 }
 0x101   :  { %472 = vlog2.f32 %v222_v55  ;;  %v217_v7 = vadd.f32 1.0, %v201_v62  ;;  %v225_v8 = vadd.f32 1.0, %v209_v63  ;;  %v212_v9 = vand.u32 2147483647, %v433_v1 }
 0x102   :  { %474 = vlog2.f32 %v219_v2  ;;  %v220_v10 = vadd.f32 1.0, %v204_v4  ;;  %v202_v11 = vand.u32 2147483647, %v153_v5  ;;  %v210_v12 = vand.u32 2147483647, %v185_v6 }
 0x103   :  { %476 = vlog2.f32 %v227_v3  ;;  %v228_v13 = vadd.f32 1.0, %v212_v9 }
 0x104   :  { %v459_v14 = vpop.eup %458  ;;  %478 = vlog2.f32 %v217_v7  ;;  %v218_v15 = vadd.f32 1.0, %v202_v11  ;;  %v226_v18 = vadd.f32 1.0, %v210_v12 }
 0x105   :  { %v461_v16 = vpop.eup %460  ;;  %v234_v17 = vmul.f32 0.6931472, %v459_v14  ;;  %480 = vlog2.f32 %v225_v8 }
 0x106   :  { %v463_v19 = vpop.eup %462  ;;  %v250_v20 = vmul.f32 0.6931472, %v461_v16  ;;  %482 = vlog2.f32 %v220_v10 }
 0x107   :  { %v465_v21 = vpop.eup %464  ;;  %v372_v22 = vpack.c.bf16 %v234_v17, %v234_v17  ;;  %v230_v23 = vmul.f32 0.6931472, %v463_v19  ;;  %484 = vlog2.f32 %v228_v13 }
 0x108   :  { %v467_v24 = vpop.eup %466  ;;  %v380_v25 = vpack.c.bf16 %v250_v20, %v250_v20  ;;  %v246_v26 = vmul.f32 0.6931472, %v465_v21  ;;  %486 = vlog2.f32 %v218_v15 }
 0x109   :  { %v469_v27 = vpop.eup %468  ;;  %328 = vst.msk [vmem:[%s643_s2 + $0x8] sm:$0xf] %vm325_vm0, %v372_v22  ;;  %v370_v28 = vpack.c.bf16 %v230_v23, %v230_v23  ;;  %v236_v29 = vmul.f32 0.6931472, %v467_v24  ;;  %488 = vlog2.f32 %v226_v18 }
 0x10a   :  { %v471_v30 = vpop.eup %470  ;;  %336 = vst.msk [vmem:[%s643_s2 + $0x28] sm:$0xf] %vm325_vm0, %v380_v25  ;;  %v378_v31 = vpack.c.bf16 %v246_v26, %v246_v26  ;;  %v252_v32 = vmul.f32 0.6931472, %v469_v27 }
 0x10b   :  { %v473_v33 = vpop.eup %472  ;;  %326 = vst.msk [vmem:[%s643_s2] sm:$0xf] %vm325_vm0, %v370_v28  ;;  %v373_v34 = vpack.c.bf16 %v236_v29, %v236_v29  ;;  %v232_v35 = vmul.f32 0.6931472, %v471_v30 }
 0x10c   :  { %v475_v36 = vpop.eup %474  ;;  %334 = vst.msk [vmem:[%s643_s2 + $0x20] sm:$0xf] %vm325_vm0, %v378_v31  ;;  %v381_v37 = vpack.c.bf16 %v252_v32, %v252_v32  ;;  %v248_v38 = vmul.f32 0.6931472, %v473_v33 }
 0x10d   :  { %v477_v39 = vpop.eup %476  ;;  %329 = vst.msk [vmem:[%s643_s2 + $0xc] sm:$0xf] %vm325_vm0, %v373_v34  ;;  %v371_v40 = vpack.c.bf16 %v232_v35, %v232_v35  ;;  %v242_v41 = vmul.f32 0.6931472, %v475_v36 }
 0x10e   :  { %v479_v42 = vpop.eup %478  ;;  %337 = vst.msk [vmem:[%s643_s2 + $0x2c] sm:$0xf] %vm325_vm0, %v381_v37  ;;  %v379_v43 = vpack.c.bf16 %v248_v38, %v248_v38  ;;  %v258_v44 = vmul.f32 0.6931472, %v477_v39 }
 0x10f   :  { %v481_v45 = vpop.eup %480  ;;  %327 = vst.msk [vmem:[%s643_s2 + $0x4] sm:$0xf] %vm325_vm0, %v371_v40  ;;  %v376_v46 = vpack.c.bf16 %v242_v41, %v242_v41  ;;  %v238_v47 = vmul.f32 0.6931472, %v479_v42 }
 0x110   :  { %v483_v48 = vpop.eup %482  ;;  %335 = vst.msk [vmem:[%s643_s2 + $0x24] sm:$0xf] %vm325_vm0, %v379_v43  ;;  %v384_v49 = vpack.c.bf16 %v258_v44, %v258_v44  ;;  %v254_v50 = vmul.f32 0.6931472, %v481_v45 }
 0x111   :  { %v485_v51 = vpop.eup %484  ;;  %332 = vst.msk [vmem:[%s643_s2 + $0x18] sm:$0xf] %vm325_vm0, %v376_v46  ;;  %v374_v52 = vpack.c.bf16 %v238_v47, %v238_v47  ;;  %v244_v53 = vmul.f32 0.6931472, %v483_v48 }
 0x112   :  { %v487_v54 = vpop.eup %486  ;;  %340 = vst.msk [vmem:[%s643_s2 + $0x38] sm:$0xf] %vm325_vm0, %v384_v49  ;;  %v382_v55 = vpack.c.bf16 %v254_v50, %v254_v50  ;;  %v260_v56 = vmul.f32 0.6931472, %v485_v51 }
 0x113   :  { %v489_v57 = vpop.eup %488  ;;  %330 = vst.msk [vmem:[%s643_s2 + $0x10] sm:$0xf] %vm325_vm0, %v374_v52  ;;  %v377_v58 = vpack.c.bf16 %v244_v53, %v244_v53  ;;  %v240_v59 = vmul.f32 0.6931472, %v487_v54 }
 0x114   :  { %338 = vst.msk [vmem:[%s643_s2 + $0x30] sm:$0xf] %vm325_vm0, %v382_v55  ;;  %v385_v60 = vpack.c.bf16 %v260_v56, %v260_v56  ;;  %v256_v61 = vmul.f32 0.6931472, %v489_v57 }
 0x115   :  { %333 = vst.msk [vmem:[%s643_s2 + $0x1c] sm:$0xf] %vm325_vm0, %v377_v58  ;;  %v375_v62 = vpack.c.bf16 %v240_v59, %v240_v59 }
 0x116   :  { %341 = vst.msk [vmem:[%s643_s2 + $0x3c] sm:$0xf] %vm325_vm0, %v385_v60  ;;  %v383_v63 = vpack.c.bf16 %v256_v61, %v256_v61 }
 0x117   :  { %331 = vst.msk [vmem:[%s643_s2 + $0x14] sm:$0xf] %vm325_vm0, %v375_v62 }
 0x118   :  { %339 = vst.msk [vmem:[%s643_s2 + $0x34] sm:$0xf] %vm325_vm0, %v383_v63 }

// kernel: cls_model_forward.3
= control target key start
LH: loop header
LB: loop body
LE: loop exit
PB: predicated region body
PF: predicated region fallthrough
CT: control target
= control target key end

     0   :  { %10 = vsyncpa [#allocation4], 0  ;;  %s4907_s0 = inlined_call_operand.vmem [shape: bf16[2,32,192], index: 0, kind: input, shape index: {}]   ;;  %s4908_s1 = inlined_call_operand.vmem [shape: bf16[192,2048], index: 1, kind: input, shape index: {}]   ;;  %s4909_s2 = inlined_call_operand.vmem [shape: f32[3,2048], index: 2, kind: input, shape index: {}]   ;;  %s4910_s3 = inlined_call_operand.vmem [shape: f32[64,2], index: 3, kind: input, shape index: {}]   ;;  %s4911_s4 = inlined_call_operand.vmem [shape: f32[1,2], index: 4, kind: input, shape index: {}]   ;;  %s4912_s5 = inlined_call_operand.hbm [shape: f32[2,1,2], index: 5, kind: output, shape index: {}]  }
   0x1   :  { %12 = vsyncpa [#allocation4 + $0x1], 0  ;;  %s3701_s18 = smov 0   ;;  %s3703_s19 = smov 0  }
   0x2   :  { %s3705_s20 = smov 0   ;;  %s3707_s21 = smov 0  }
   0x3   :  { %s3709_s22 = smov 0   ;;  %s3711_s23 = smov 0  }
   0x4 LB: > { %s3246_s24 = sadd.s32 4294967295, %s3663_s23   ;;  %s3247_s25 = sadd.s32 4294967294, %s3663_s23   ;;  %s3663_s23 = sphi %s3711_s23, %s18_s23   ;;  %s3659_s22 = sphi %s3709_s22, %s4919_s22   ;;  %s3655_s21 = sphi %s3707_s21, %s4918_s21   ;;  %s3651_s20 = sphi %s3705_s20, %s4917_s20   ;;  %s3647_s19 = sphi %s3703_s19, %s4916_s19   ;;  %s3643_s18 = sphi %s3701_s18, %s4915_s18  }
   0x5   : > { %s37_s26 = sadd.s32 1, %s3659_s22  ;;  %s158_s27 = sadd.s32 1, %s3651_s20 }
   0x6   : > { %p39_p0 = scmp.ge.s32.totalorder %s37_s26, 2  ;;  %p168_p1 = scmp.ne.s32.totalorder %s3651_s20, %s3647_s19 }
   0x7   : > { %p169_p2 = scmp.eq.s32.totalorder %s3246_s24, 1  ;;  %p174_p3 = scmp.ne.s32.totalorder %s3647_s19, %s3643_s18 }
   0x8   : > { %s4921_s26 = smov (%p39_p0, %s37_s26), 0  ;;  %p175_p5 = scmp.eq.s32.totalorder %s3247_s25, 1 }
   0x9   : > { %p3741_p4 = por %p169_p2, %p168_p1  ;;  %s155_s29 = ssub.s32 %s3659_s22, %s4921_s26 }
   0xa   : > { %p3250_p6 = scmp.ge.s32.totalorder %s3663_s23, 1  ;;  %p156_p7 = scmp.eq.s32.totalorder %s155_s29, 0 }
   0xb   : > { %p3748_p8 = por %p175_p5, %p174_p3  ;;  %p221_p9 = scmp.lt.s32.totalorder %s3663_s23, 3 }
   0xc   : > { %s3754_s6 = scalar_select %p156_p7, %s3651_s20, %s158_s27  }
   0xd   : > { %p222_p10 = pnand %p3250_p6, %p221_p9 }
   0xe   : > { %v280_v0 = vld [vmem:[%s4908_s1] sm:$0xff] (!%p222_p10)  ;;  %v281_v2 = vld [vmem:[%s4908_s1 + $0x8] sm:$0xff] (!%p222_p10)  ;;  %p256_p11 = scmp.lt.s32.totalorder (!%p222_p10), %s3655_s21, 1  ;;  %vm1990_vm0 = vcmask (!%p222_p10), 523264   ;;  %s3667_s9 = smov (!%p222_p10), 64   ;;  %vm3669_vm3 = vmmov (!%p222_p10), 0  }
   0xf   : > { %225 = sbr.rel (%p222_p10) target bundleno = 878 (0x36e), region = 40  ;;  %v288_v1 = vld [vmem:[%s4908_s1 + $0x40] sm:$0xff] (!%p222_p10)  ;;  %v289_v4 = vld [vmem:[%s4908_s1 + $0x48] sm:$0xff] (!%p222_p10)  ;;  %s252_s11 = sand.u32 (!%p222_p10), 1, %s3647_s19   ;;  %vm3156_vm4 = vcmask (!%p222_p10), 8192  }
  0x10   : > { %v3263_v3 = vcombine.high (!%p222_p10), %v280_v0, %v288_v1  ;;  %v3262_v5 = vcombine.low (!%p222_p10), %v280_v0, %v288_v1  ;;  %v296_v6 = vld [vmem:[%s4908_s1 + $0x80] sm:$0xff] (!%p222_p10)  ;;  %v3265_v8 = vcombine.high (!%p222_p10), %v281_v2, %v289_v4  ;;  %v3264_v9 = vcombine.low (!%p222_p10), %v281_v2, %v289_v4  ;;  %v297_v11 = vld [vmem:[%s4908_s1 + $0x88] sm:$0xff] (!%p222_p10)  ;;  %s3471_s13 = sshll.u32 (!%p222_p10), %s3655_s21, 4  ;;  %s253_s15 = scalar_lea.vmem (!%p222_p10), [#allocation3], %s252_s11 }
  0x11   : > { %v304_v7 = vld [vmem:[%s4908_s1 + $0xc0] sm:$0xff] (!%p222_p10)  ;;  %v305_v12 = vld [vmem:[%s4908_s1 + $0xc8] sm:$0xff] (!%p222_p10)  ;;  %s4860_s24 = scalar_lea.hbm (!%p222_p10), %s4912_s5, %s3471_s13  ;;  %s3159_s25 = scalar_lea.sflag (!%p222_p10), [#allocation4], %s252_s11 }
  0x12   : > { %v3279_v10 = vcombine.high (!%p222_p10), %v296_v6, %v304_v7  ;;  %v312_v13 = vld [vmem:[%s4908_s1 + $0x100] sm:$0xff] (!%p222_p10)  ;;  %1997 = vmatprep.subr.bf16.mxu0 (!%p222_p10), %v3263_v3  ;;  %v3281_v14 = vcombine.high (!%p222_p10), %v297_v11, %v305_v12  ;;  %v313_v16 = vld [vmem:[%s4908_s1 + $0x108] sm:$0xff] (!%p222_p10)  ;;  %2050 = vmatprep.subr.bf16.mxu1 (!%p222_p10), %v3265_v8  ;;  %v3278_v18 = vcombine.low (!%p222_p10), %v296_v6, %v304_v7 }
  0x13   : > { %v320_v15 = vld [vmem:[%s4908_s1 + $0x140] sm:$0xff] (!%p222_p10)  ;;  %v321_v17 = vld [vmem:[%s4908_s1 + $0x148] sm:$0xff] (!%p222_p10)  ;;  %1998 = vmatpush1.bf16.msra.mxu0 (!%p222_p10), %v3262_v5  ;;  %2051 = vmatpush1.bf16.msra.mxu1 (!%p222_p10), %v3264_v9  ;;  %v3280_v19 = vcombine.low (!%p222_p10), %v297_v11, %v305_v12 }
  0x14   : > { %1999 = vmatprep.subr.bf16.mxu0 (!%p222_p10), %v3279_v10  ;;  %v3295_v20 = vcombine.high (!%p222_p10), %v312_v13, %v320_v15  ;;  %2052 = vmatprep.subr.bf16.mxu1 (!%p222_p10), %v3281_v14  ;;  %v3297_v21 = vcombine.high (!%p222_p10), %v313_v16, %v321_v17  ;;  %v328_v22 = vld [vmem:[%s4908_s1 + $0x180] sm:$0xff] (!%p222_p10)  ;;  %v329_v24 = vld [vmem:[%s4908_s1 + $0x188] sm:$0xff] (!%p222_p10)  ;;  %v3294_v26 = vcombine.low (!%p222_p10), %v312_v13, %v320_v15 }
  0x15   : > { %v336_v23 = vld [vmem:[%s4908_s1 + $0x1c0] sm:$0xff] (!%p222_p10)  ;;  %v337_v25 = vld [vmem:[%s4908_s1 + $0x1c8] sm:$0xff] (!%p222_p10)  ;;  %v3296_v27 = vcombine.low (!%p222_p10), %v313_v16, %v321_v17 }
  0x16   : > { %s257_s27 = scalar_select %p256_p11, %s3655_s21, 1  ;;  %v3311_v28 = vcombine.high %v328_v22, %v336_v23  ;;  %v3313_v29 = vcombine.high %v329_v24, %v337_v25  ;;  %v344_v30 = vld [vmem:[%s4908_s1 + $0x200] sm:$0xff]  ;;  %v345_v32 = vld [vmem:[%s4908_s1 + $0x208] sm:$0xff]  ;;  %v3310_v34 = vcombine.low %v328_v22, %v336_v23  ;;  %v3312_v35 = vcombine.low %v329_v24, %v337_v25 }
  0x17   : > { %2000 = vmatpush1.bf16.msra.mxu0 %v3278_v18  ;;  %2053 = vmatpush1.bf16.msra.mxu1 %v3280_v19  ;;  %v352_v31 = vld [vmem:[%s4908_s1 + $0x240] sm:$0xff]  ;;  %v353_v33 = vld [vmem:[%s4908_s1 + $0x248] sm:$0xff]  ;;  %s3670_s21 = smov [#allocation3]  }
  0x18   : > { %2001 = vmatprep.subr.bf16.mxu0 %v3295_v20  ;;  %2054 = vmatprep.subr.bf16.mxu1 %v3297_v21  ;;  %s3474_s14 = sshll.u32 %s257_s27, 5  ;;  %v3327_v36 = vcombine.high %v344_v30, %v352_v31  ;;  %v3329_v37 = vcombine.high %v345_v32, %v353_v33  ;;  %v360_v38 = vld [vmem:[%s4908_s1 + $0x280] sm:$0xff]  ;;  %v361_v40 = vld [vmem:[%s4908_s1 + $0x288] sm:$0xff]  ;;  %v3326_v42 = vcombine.low %v344_v30, %v352_v31  ;;  %v282_v31 = vld [vmem:[%s4908_s1 + $0x10] sm:$0xff]  ;;  %s3589_s27 = sshll.u32 %s3670_s21, 4  ;;  %s3590_s27 = int_to_ptr.vmem [resolvable:$false] %s3589_s27 }
  0x19   : > { %s3823_s7 = scalar_lea.vmem %s4907_s0, %s3474_s14  ;;  %v368_v39 = vld [vmem:[%s4908_s1 + $0x2c0] sm:$0xff]  ;;  %v369_v41 = vld [vmem:[%s4908_s1 + $0x2c8] sm:$0xff]  ;;  %v3328_v44 = vcombine.low %v345_v32, %v353_v33  ;;  %v290_v32 = vld [vmem:[%s4908_s1 + $0x50] sm:$0xff]  ;;  %s3171_s14 = sshll.u32 %s253_s15, 4  ;;  %s4862_s14 = int_to_ptr.vmem [resolvable:$true] %s3171_s14 }
  0x1a   : > { %v3838_v43 = vld [vmem:[%s3823_s7 + $0x4] ss:$8 sps:$4 sm:$0xff]   ;;  %v3343_v45 = vcombine.high %v360_v38, %v368_v39  ;;  %v3345_v46 = vcombine.high %v361_v40, %v369_v41  ;;  %v3342_v51 = vcombine.low %v360_v38, %v368_v39  ;;  %v3344_v52 = vcombine.low %v361_v40, %v369_v41  ;;  %v283_v33 = vld [vmem:[%s4908_s1 + $0x18] sm:$0xff]  ;;  %v298_v39 = vld [vmem:[%s4908_s1 + $0x90] sm:$0xff]  ;;  %s3585_s29 = scalar_lea.vmem %s4862_s14, 16  ;;  %s3591_s8 = scalar_lea.vmem %s3590_s27, 32 }
  0x1b   : > { %2002 = vmatpush1.bf16.msra.mxu0 %v3294_v26  ;;  %2055 = vmatpush1.bf16.msra.mxu1 %v3296_v27  ;;  %v376_v47 = vld [vmem:[%s4908_s1 + $0x300] sm:$0xff]  ;;  %v377_v49 = vld [vmem:[%s4908_s1 + $0x308] sm:$0xff]  ;;  %v306_v40 = vld [vmem:[%s4908_s1 + $0xd0] sm:$0xff]  ;;  %p3586_p12 = scmp.ne.s32.totalorder %s4862_s14, %s3585_s29  ;;  %p3592_p1 = scmp.lt.s32.totalorder %s4862_s14, %s3590_s27 }
  0x1c   : > { %2003 = vmatprep.subr.bf16.mxu0 %v3311_v28  ;;  %2056 = vmatprep.subr.bf16.mxu1 %v3313_v29  ;;  %v384_v48 = vld [vmem:[%s4908_s1 + $0x340] sm:$0xff]  ;;  %v385_v50 = vld [vmem:[%s4908_s1 + $0x348] sm:$0xff]  ;;  %p3593_p2 = scmp.lt.s32.totalorder %s3591_s8, %s3585_s29 }
  0x1d   : > { %3454 = vmatprep.mubr.msk.bf16.mxu0 %vm1990_vm0, %v3838_v43  ;;  %3456 = vmatprep.mubr.msk.bf16.mxu1 %vm1990_vm0, %v3838_v43  ;;  %v3359_v53 = vcombine.high %v376_v47, %v384_v48  ;;  %v3361_v54 = vcombine.high %v377_v49, %v385_v50  ;;  %v392_v55 = vld [vmem:[%s4908_s1 + $0x380] sm:$0xff]  ;;  %v393_v57 = vld [vmem:[%s4908_s1 + $0x388] sm:$0xff]  ;;  %v3358_v59 = vcombine.low %v376_v47, %v384_v48  ;;  %p3587_p13 = pnand %p3586_p12, %p3741_p4 }
  0x1e   : > { %v400_v56 = vld [vmem:[%s4908_s1 + $0x3c0] sm:$0xff]  ;;  %v401_v58 = vld [vmem:[%s4908_s1 + $0x3c8] sm:$0xff]  ;;  %v3360_v60 = vcombine.low %v377_v49, %v385_v50  ;;  %v3283_v47 = vcombine.high %v298_v39, %v306_v40  ;;  %v3944_v49 = vld [vmem:[%s3823_s7 + $0x14] ss:$8 sps:$4 sm:$0xff]   ;;  %p3594_p3 = por %p3593_p2, %p3592_p1 }
  0x1f   : > { %2004 = vmatpush1.bf16.msra.mxu0 %v3310_v34  ;;  %2057 = vmatpush1.bf16.msra.mxu1 %v3312_v35  ;;  %v3375_v61 = vcombine.high %v392_v55, %v400_v56  ;;  %v3377_v62 = vcombine.high %v393_v57, %v401_v58  ;;  %v408_v63 = vld [vmem:[%s4908_s1 + $0x400] sm:$0xff]  ;;  %v409_v1 = vld [vmem:[%s4908_s1 + $0x408] sm:$0xff]  ;;  %v3374_v3 = vcombine.low %v392_v55, %v400_v56  ;;  %v291_v34 = vld [vmem:[%s4908_s1 + $0x58] sm:$0xff]  ;;  %p3588_p0 = pneg %p3587_p13 }
  0x20   : > { %2005 = vmatprep.subr.bf16.mxu0 %v3327_v36  ;;  %2058 = vmatprep.subr.bf16.mxu1 %v3329_v37  ;;  %v416_v0 = vld [vmem:[%s4908_s1 + $0x440] sm:$0xff]  ;;  %v417_v2 = vld [vmem:[%s4908_s1 + $0x448] sm:$0xff]  ;;  %v3376_v4 = vcombine.low %v393_v57, %v401_v58  ;;  %v3267_v37 = vcombine.high %v282_v31, %v290_v32  ;;  %v3269_v38 = vcombine.high %v283_v33, %v291_v34  ;;  %v314_v50 = vld [vmem:[%s4908_s1 + $0x110] sm:$0xff] }
  0x21   : > { %v3391_v5 = vcombine.high %v408_v63, %v416_v0  ;;  %v3393_v6 = vcombine.high %v409_v1, %v417_v2  ;;  %v424_v7 = vld [vmem:[%s4908_s1 + $0x480] sm:$0xff]  ;;  %v425_v9 = vld [vmem:[%s4908_s1 + $0x488] sm:$0xff]  ;;  %v3390_v11 = vcombine.low %v408_v63, %v416_v0  ;;  %v3392_v12 = vcombine.low %v409_v1, %v417_v2  ;;  %v330_v58 = vld [vmem:[%s4908_s1 + $0x190] sm:$0xff]  ;;  %p3595_p5 = pnand %p3594_p3, %p3588_p0 }
  0x22   : > { %v432_v8 = vld [vmem:[%s4908_s1 + $0x4c0] sm:$0xff]  ;;  %v433_v10 = vld [vmem:[%s4908_s1 + $0x4c8] sm:$0xff] }
  0x23   : > { %2006 = vmatpush1.bf16.msra.mxu0 %v3326_v42  ;;  %2059 = vmatpush1.bf16.msra.mxu1 %v3328_v44  ;;  %v3407_v13 = vcombine.high %v424_v7, %v432_v8  ;;  %v3409_v14 = vcombine.high %v425_v9, %v433_v10  ;;  %v440_v15 = vld [vmem:[%s4908_s1 + $0x500] sm:$0xff]  ;;  %v441_v17 = vld [vmem:[%s4908_s1 + $0x508] sm:$0xff]  ;;  %v3406_v19 = vcombine.low %v424_v7, %v432_v8  ;;  %v299_v42 = vld [vmem:[%s4908_s1 + $0x98] sm:$0xff] }
  0x24   : > { %2007 = vmatprep.subr.bf16.mxu0 %v3343_v45  ;;  %2060 = vmatprep.subr.bf16.mxu1 %v3345_v46  ;;  %v448_v16 = vld [vmem:[%s4908_s1 + $0x540] sm:$0xff]  ;;  %v449_v18 = vld [vmem:[%s4908_s1 + $0x548] sm:$0xff]  ;;  %v3408_v20 = vcombine.low %v425_v9, %v433_v10  ;;  %v307_v44 = vld [vmem:[%s4908_s1 + $0xd8] sm:$0xff]  ;;  %v3266_v45 = vcombine.low %v282_v31, %v290_v32  ;;  %v3268_v46 = vcombine.low %v283_v33, %v291_v34 }
  0x25   : > { %v3423_v21 = vcombine.high %v440_v15, %v448_v16  ;;  %v3425_v22 = vcombine.high %v441_v17, %v449_v18  ;;  %v456_v23 = vld [vmem:[%s4908_s1 + $0x580] sm:$0xff]  ;;  %v457_v25 = vld [vmem:[%s4908_s1 + $0x588] sm:$0xff]  ;;  %v3422_v27 = vcombine.low %v440_v15, %v448_v16  ;;  %v3424_v28 = vcombine.low %v441_v17, %v449_v18 }
  0x26   : > { %v464_v24 = vld [vmem:[%s4908_s1 + $0x5c0] sm:$0xff]  ;;  %v465_v26 = vld [vmem:[%s4908_s1 + $0x5c8] sm:$0xff]  ;;  %v3285_v48 = vcombine.high %v299_v42, %v307_v44  ;;  %v3284_v55 = vcombine.low %v299_v42, %v307_v44 }
  0x27   : > { %2008 = vmatpush1.bf16.msra.mxu0 %v3342_v51  ;;  %2061 = vmatpush1.bf16.msra.mxu1 %v3344_v52  ;;  %v3439_v29 = vcombine.high %v456_v23, %v464_v24  ;;  %v3441_v30 = vcombine.high %v457_v25, %v465_v26  ;;  %v3438_v35 = vcombine.low %v456_v23, %v464_v24  ;;  %v3935_v41 = vld [vmem:[%s3823_s7] ss:$8 sps:$4 sm:$0xff]   ;;  %v322_v51 = vld [vmem:[%s4908_s1 + $0x150] sm:$0xff]  ;;  %v315_v52 = vld [vmem:[%s4908_s1 + $0x118] sm:$0xff] }
  0x28   : > { %2009 = vmatprep.subr.bf16.mxu0 %v3359_v53  ;;  %2062 = vmatprep.subr.bf16.mxu1 %v3361_v54  ;;  %v3440_v36 = vcombine.low %v457_v25, %v465_v26  ;;  %v323_v53 = vld [vmem:[%s4908_s1 + $0x158] sm:$0xff]  ;;  %v3282_v54 = vcombine.low %v298_v39, %v306_v40  ;;  %v3299_v56 = vcombine.high %v314_v50, %v322_v51 }
  0x29   : > { %v3301_v57 = vcombine.high %v315_v52, %v323_v53  ;;  %v3298_v63 = vcombine.low %v314_v50, %v322_v51  ;;  %v3300_v0 = vcombine.low %v315_v52, %v323_v53 }
  0x2b   : > { %2010 = vmatpush1.bf16.msra.mxu0 %v3358_v59  ;;  %2063 = vmatpush1.bf16.msra.mxu1 %v3360_v60  ;;  %v338_v59 = vld [vmem:[%s4908_s1 + $0x1d0] sm:$0xff] }
  0x2c   : > { %2011 = vmatprep.subr.bf16.mxu0 %v3375_v61  ;;  %2064 = vmatprep.subr.bf16.mxu1 %v3377_v62  ;;  %v3971_v60 = vld [vmem:[%s3823_s7 + $0x10] ss:$8 sps:$4 sm:$0xff]   ;;  %v3315_v1 = vcombine.high %v330_v58, %v338_v59  ;;  %v3314_v7 = vcombine.low %v330_v58, %v338_v59 }
  0x2d   : > { %v331_v61 = vld [vmem:[%s4908_s1 + $0x198] sm:$0xff] }
  0x2e   : > { %v339_v62 = vld [vmem:[%s4908_s1 + $0x1d8] sm:$0xff] }
  0x2f   : > { %2012 = vmatpush1.bf16.msra.mxu0 %v3374_v3  ;;  %2065 = vmatpush1.bf16.msra.mxu1 %v3376_v4  ;;  %v3317_v2 = vcombine.high %v331_v61, %v339_v62  ;;  %v346_v3 = vld [vmem:[%s4908_s1 + $0x210] sm:$0xff]  ;;  %v3316_v8 = vcombine.low %v331_v61, %v339_v62 }
  0x30   : > { %2013 = vmatprep.subr.bf16.mxu0 %v3391_v5  ;;  %2066 = vmatprep.subr.bf16.mxu1 %v3393_v6  ;;  %v354_v4 = vld [vmem:[%s4908_s1 + $0x250] sm:$0xff]  ;;  %v347_v5 = vld [vmem:[%s4908_s1 + $0x218] sm:$0xff] }
  0x31   : > { %v355_v6 = vld [vmem:[%s4908_s1 + $0x258] sm:$0xff]  ;;  %v3331_v9 = vcombine.high %v346_v3, %v354_v4  ;;  %v3330_v15 = vcombine.low %v346_v3, %v354_v4 }
  0x32   : > { %v3333_v10 = vcombine.high %v347_v5, %v355_v6  ;;  %v3332_v16 = vcombine.low %v347_v5, %v355_v6 }
  0x33   : > { %2014 = vmatpush1.bf16.msra.mxu0 %v3390_v11  ;;  %2067 = vmatpush1.bf16.msra.mxu1 %v3392_v12  ;;  %v362_v11 = vld [vmem:[%s4908_s1 + $0x290] sm:$0xff] }
  0x34   : > { %2015 = vmatprep.subr.bf16.mxu0 %v3407_v13  ;;  %2068 = vmatprep.subr.bf16.mxu1 %v3409_v14  ;;  %v370_v12 = vld [vmem:[%s4908_s1 + $0x2d0] sm:$0xff]  ;;  %v363_v13 = vld [vmem:[%s4908_s1 + $0x298] sm:$0xff] }
  0x35   : > { %v371_v14 = vld [vmem:[%s4908_s1 + $0x2d8] sm:$0xff]  ;;  %v3347_v17 = vcombine.high %v362_v11, %v370_v12  ;;  %v3346_v23 = vcombine.low %v362_v11, %v370_v12 }
  0x36   : > { %v3349_v18 = vcombine.high %v363_v13, %v371_v14  ;;  %v3348_v24 = vcombine.low %v363_v13, %v371_v14 }
  0x37   : > { %2016 = vmatpush1.bf16.msra.mxu0 %v3406_v19  ;;  %2069 = vmatpush1.bf16.msra.mxu1 %v3408_v20  ;;  %v378_v19 = vld [vmem:[%s4908_s1 + $0x310] sm:$0xff] }
  0x38   : > { %2017 = vmatprep.subr.bf16.mxu0 %v3423_v21  ;;  %2070 = vmatprep.subr.bf16.mxu1 %v3425_v22  ;;  %v386_v20 = vld [vmem:[%s4908_s1 + $0x350] sm:$0xff]  ;;  %v379_v21 = vld [vmem:[%s4908_s1 + $0x318] sm:$0xff] }
  0x39   : > { %v387_v22 = vld [vmem:[%s4908_s1 + $0x358] sm:$0xff]  ;;  %v3363_v25 = vcombine.high %v378_v19, %v386_v20  ;;  %v3362_v31 = vcombine.low %v378_v19, %v386_v20 }
  0x3a   : > { %v3365_v26 = vcombine.high %v379_v21, %v387_v22  ;;  %v3364_v32 = vcombine.low %v379_v21, %v387_v22 }
  0x3b   : > { %2018 = vmatpush1.bf16.msra.mxu0 %v3422_v27  ;;  %2071 = vmatpush1.bf16.msra.mxu1 %v3424_v28  ;;  %v394_v27 = vld [vmem:[%s4908_s1 + $0x390] sm:$0xff] }
  0x3c   : > { %2019 = vmatprep.subr.bf16.mxu0 %v3439_v29  ;;  %2072 = vmatprep.subr.bf16.mxu1 %v3441_v30  ;;  %v402_v28 = vld [vmem:[%s4908_s1 + $0x3d0] sm:$0xff]  ;;  %v395_v29 = vld [vmem:[%s4908_s1 + $0x398] sm:$0xff] }
  0x3d   : > { %v403_v30 = vld [vmem:[%s4908_s1 + $0x3d8] sm:$0xff]  ;;  %v3379_v33 = vcombine.high %v394_v27, %v402_v28  ;;  %v3378_v39 = vcombine.low %v394_v27, %v402_v28 }
  0x3e   : > { %v3381_v34 = vcombine.high %v395_v29, %v403_v30  ;;  %v3380_v40 = vcombine.low %v395_v29, %v403_v30 }
  0x3f   : > { %2020 = vmatpush1.bf16.msra.mxu0 %v3438_v35  ;;  %2073 = vmatpush1.bf16.msra.mxu1 %v3440_v36  ;;  %v410_v35 = vld [vmem:[%s4908_s1 + $0x410] sm:$0xff] }
  0x40   : > { %2103 = vmatprep.subr.bf16.mxu0 %v3267_v37  ;;  %2156 = vmatprep.subr.bf16.mxu1 %v3269_v38  ;;  %v418_v36 = vld [vmem:[%s4908_s1 + $0x450] sm:$0xff]  ;;  %v411_v37 = vld [vmem:[%s4908_s1 + $0x418] sm:$0xff] }
  0x41   : > { %v419_v38 = vld [vmem:[%s4908_s1 + $0x458] sm:$0xff]  ;;  %v3395_v42 = vcombine.high %v410_v35, %v418_v36  ;;  %v3394_v50 = vcombine.low %v410_v35, %v418_v36 }
  0x42   : > { %2030 = vmatmul.mubr.bf16.vlgmr.msra.gmra.mrb[0].mxu0 %v3935_v41  ;;  %2083 = vmatmul.mubr.bf16.vlgmr.msra.gmra.mrb[0].mxu1 %v3935_v41  ;;  %v3397_v44 = vcombine.high %v411_v37, %v419_v38  ;;  %v3396_v51 = vcombine.low %v411_v37, %v419_v38 }
  0x43   : > { %2104 = vmatpush1.bf16.msra.mxu0 %v3266_v45  ;;  %2157 = vmatpush1.bf16.msra.mxu1 %v3268_v46  ;;  %v426_v45 = vld [vmem:[%s4908_s1 + $0x490] sm:$0xff] }
  0x44   : > { %2105 = vmatprep.subr.bf16.mxu0 %v3283_v47  ;;  %2158 = vmatprep.subr.bf16.mxu1 %v3285_v48  ;;  %v434_v46 = vld [vmem:[%s4908_s1 + $0x4d0] sm:$0xff]  ;;  %v427_v47 = vld [vmem:[%s4908_s1 + $0x498] sm:$0xff] }
  0x45   : > { %3455 = vmatprep.mubr.msk.bf16.mxu0 %vm1990_vm0, %v3944_v49  ;;  %3457 = vmatprep.mubr.msk.bf16.mxu1 %vm1990_vm0, %v3944_v49  ;;  %v435_v48 = vld [vmem:[%s4908_s1 + $0x4d8] sm:$0xff]  ;;  %v3411_v52 = vcombine.high %v426_v45, %v434_v46  ;;  %v3410_v58 = vcombine.low %v426_v45, %v434_v46 }
  0x46   : > { %v3413_v53 = vcombine.high %v427_v47, %v435_v48  ;;  %v3412_v59 = vcombine.low %v427_v47, %v435_v48 }
  0x47   : > { %2106 = vmatpush1.bf16.msra.mxu0 %v3282_v54  ;;  %2159 = vmatpush1.bf16.msra.mxu1 %v3284_v55  ;;  %v442_v54 = vld [vmem:[%s4908_s1 + $0x510] sm:$0xff] }
  0x48   : > { %2107 = vmatprep.subr.bf16.mxu0 %v3299_v56  ;;  %2160 = vmatprep.subr.bf16.mxu1 %v3301_v57  ;;  %v450_v55 = vld [vmem:[%s4908_s1 + $0x550] sm:$0xff]  ;;  %v443_v56 = vld [vmem:[%s4908_s1 + $0x518] sm:$0xff] }
  0x49   : > { %v451_v57 = vld [vmem:[%s4908_s1 + $0x558] sm:$0xff]  ;;  %v3427_v61 = vcombine.high %v442_v54, %v450_v55  ;;  %v3426_v3 = vcombine.low %v442_v54, %v450_v55 }
  0x4a   : > { %2040 = vmatmul.mubr.bf16.gmra.mrb[4].mxu0 %v3971_v60  ;;  %2093 = vmatmul.mubr.bf16.gmra.mrb[4].mxu1 %v3971_v60  ;;  %v3429_v62 = vcombine.high %v443_v56, %v451_v57  ;;  %v3428_v4 = vcombine.low %v443_v56, %v451_v57 }
  0x4b   : > { %2108 = vmatpush1.bf16.msra.mxu0 %v3298_v63  ;;  %2161 = vmatpush1.bf16.msra.mxu1 %v3300_v0  ;;  %v458_v63 = vld [vmem:[%s4908_s1 + $0x590] sm:$0xff] }
  0x4c   : > { %2109 = vmatprep.subr.bf16.mxu0 %v3315_v1  ;;  %2162 = vmatprep.subr.bf16.mxu1 %v3317_v2  ;;  %v466_v0 = vld [vmem:[%s4908_s1 + $0x5d0] sm:$0xff]  ;;  %v459_v1 = vld [vmem:[%s4908_s1 + $0x598] sm:$0xff] }
  0x4d   : > { %3458 = vmatprep.mubr.msk.bf16.mxu0 %vm1990_vm0, %v3838_v43  ;;  %3460 = vmatprep.mubr.msk.bf16.mxu1 %vm1990_vm0, %v3838_v43  ;;  %v467_v2 = vld [vmem:[%s4908_s1 + $0x5d8] sm:$0xff]  ;;  %v3443_v5 = vcombine.high %v458_v63, %v466_v0  ;;  %v3442_v11 = vcombine.low %v458_v63, %v466_v0 }
  0x4e   : > { %v3445_v6 = vcombine.high %v459_v1, %v467_v2  ;;  %v3444_v12 = vcombine.low %v459_v1, %v467_v2 }
  0x4f   : > { %2110 = vmatpush1.bf16.msra.mxu0 %v3314_v7  ;;  %2163 = vmatpush1.bf16.msra.mxu1 %v3316_v8  ;;  %v284_v7 = vld [vmem:[%s4908_s1 + $0x20] sm:$0xff] }
  0x50   : > { %2111 = vmatprep.subr.bf16.mxu0 %v3331_v9  ;;  %2164 = vmatprep.subr.bf16.mxu1 %v3333_v10  ;;  %v292_v8 = vld [vmem:[%s4908_s1 + $0x60] sm:$0xff]  ;;  %v285_v9 = vld [vmem:[%s4908_s1 + $0x28] sm:$0xff] }
  0x51   : > { %v293_v10 = vld [vmem:[%s4908_s1 + $0x68] sm:$0xff]  ;;  %v3271_v13 = vcombine.high %v284_v7, %v292_v8  ;;  %v3270_v19 = vcombine.low %v284_v7, %v292_v8 }
  0x52   : > { %v3273_v14 = vcombine.high %v285_v9, %v293_v10  ;;  %v3272_v20 = vcombine.low %v285_v9, %v293_v10 }
  0x53   : > { %2112 = vmatpush1.bf16.msra.mxu0 %v3330_v15  ;;  %2165 = vmatpush1.bf16.msra.mxu1 %v3332_v16  ;;  %v300_v15 = vld [vmem:[%s4908_s1 + $0xa0] sm:$0xff] }
  0x54   : > { %2113 = vmatprep.subr.bf16.mxu0 %v3347_v17  ;;  %2166 = vmatprep.subr.bf16.mxu1 %v3349_v18  ;;  %v308_v16 = vld [vmem:[%s4908_s1 + $0xe0] sm:$0xff]  ;;  %v301_v17 = vld [vmem:[%s4908_s1 + $0xa8] sm:$0xff] }
  0x55   : > { %v309_v18 = vld [vmem:[%s4908_s1 + $0xe8] sm:$0xff]  ;;  %v3287_v21 = vcombine.high %v300_v15, %v308_v16  ;;  %v3286_v27 = vcombine.low %v300_v15, %v308_v16 }
  0x56   : > { %v3289_v22 = vcombine.high %v301_v17, %v309_v18  ;;  %v3288_v28 = vcombine.low %v301_v17, %v309_v18 }
  0x57   : > { %2114 = vmatpush1.bf16.msra.mxu0 %v3346_v23  ;;  %2167 = vmatpush1.bf16.msra.mxu1 %v3348_v24  ;;  %v316_v23 = vld [vmem:[%s4908_s1 + $0x120] sm:$0xff] }
  0x58   : > { %2115 = vmatprep.subr.bf16.mxu0 %v3363_v25  ;;  %2168 = vmatprep.subr.bf16.mxu1 %v3365_v26  ;;  %v324_v24 = vld [vmem:[%s4908_s1 + $0x160] sm:$0xff]  ;;  %v317_v25 = vld [vmem:[%s4908_s1 + $0x128] sm:$0xff] }
  0x59   : > { %v325_v26 = vld [vmem:[%s4908_s1 + $0x168] sm:$0xff]  ;;  %v3303_v29 = vcombine.high %v316_v23, %v324_v24  ;;  %v3302_v35 = vcombine.low %v316_v23, %v324_v24 }
  0x5a   : > { %v3305_v30 = vcombine.high %v317_v25, %v325_v26  ;;  %v3304_v36 = vcombine.low %v317_v25, %v325_v26 }
  0x5b   : > { %2116 = vmatpush1.bf16.msra.mxu0 %v3362_v31  ;;  %2169 = vmatpush1.bf16.msra.mxu1 %v3364_v32  ;;  %v332_v31 = vld [vmem:[%s4908_s1 + $0x1a0] sm:$0xff] }
  0x5c   : > { %2117 = vmatprep.subr.bf16.mxu0 %v3379_v33  ;;  %2170 = vmatprep.subr.bf16.mxu1 %v3381_v34  ;;  %v340_v32 = vld [vmem:[%s4908_s1 + $0x1e0] sm:$0xff]  ;;  %v333_v33 = vld [vmem:[%s4908_s1 + $0x1a8] sm:$0xff] }
  0x5d   : > { %v341_v34 = vld [vmem:[%s4908_s1 + $0x1e8] sm:$0xff]  ;;  %v3319_v37 = vcombine.high %v332_v31, %v340_v32  ;;  %v3318_v45 = vcombine.low %v332_v31, %v340_v32 }
  0x5e   : > { %v3321_v38 = vcombine.high %v333_v33, %v341_v34  ;;  %v3320_v46 = vcombine.low %v333_v33, %v341_v34 }
  0x5f   : > { %2118 = vmatpush1.bf16.msra.mxu0 %v3378_v39  ;;  %2171 = vmatpush1.bf16.msra.mxu1 %v3380_v40  ;;  %v348_v39 = vld [vmem:[%s4908_s1 + $0x220] sm:$0xff] }
  0x60   : > { %2119 = vmatprep.subr.bf16.mxu0 %v3395_v42  ;;  %2172 = vmatprep.subr.bf16.mxu1 %v3397_v44  ;;  %v356_v40 = vld [vmem:[%s4908_s1 + $0x260] sm:$0xff]  ;;  %v349_v42 = vld [vmem:[%s4908_s1 + $0x228] sm:$0xff] }
  0x61   : > { %v357_v44 = vld [vmem:[%s4908_s1 + $0x268] sm:$0xff]  ;;  %v3335_v47 = vcombine.high %v348_v39, %v356_v40  ;;  %v3334_v54 = vcombine.low %v348_v39, %v356_v40 }
  0x62   : > { %v3337_v48 = vcombine.high %v349_v42, %v357_v44  ;;  %v3336_v55 = vcombine.low %v349_v42, %v357_v44 }
  0x63   : > { %2120 = vmatpush1.bf16.msra.mxu0 %v3394_v50  ;;  %2173 = vmatpush1.bf16.msra.mxu1 %v3396_v51  ;;  %v364_v50 = vld [vmem:[%s4908_s1 + $0x2a0] sm:$0xff] }
  0x64   : > { %2121 = vmatprep.subr.bf16.mxu0 %v3411_v52  ;;  %2174 = vmatprep.subr.bf16.mxu1 %v3413_v53  ;;  %v372_v51 = vld [vmem:[%s4908_s1 + $0x2e0] sm:$0xff]  ;;  %v365_v52 = vld [vmem:[%s4908_s1 + $0x2a8] sm:$0xff] }
  0x65   : > { %v373_v53 = vld [vmem:[%s4908_s1 + $0x2e8] sm:$0xff]  ;;  %v3351_v56 = vcombine.high %v364_v50, %v372_v51  ;;  %v3350_v63 = vcombine.low %v364_v50, %v372_v51 }
  0x66   : > { %v3353_v57 = vcombine.high %v365_v52, %v373_v53  ;;  %v3352_v0 = vcombine.low %v365_v52, %v373_v53 }
  0x67   : > { %2122 = vmatpush1.bf16.msra.mxu0 %v3410_v58  ;;  %2175 = vmatpush1.bf16.msra.mxu1 %v3412_v59  ;;  %v380_v58 = vld [vmem:[%s4908_s1 + $0x320] sm:$0xff] }
  0x68   : > { %2123 = vmatprep.subr.bf16.mxu0 %v3427_v61  ;;  %2176 = vmatprep.subr.bf16.mxu1 %v3429_v62  ;;  %v388_v59 = vld [vmem:[%s4908_s1 + $0x360] sm:$0xff]  ;;  %v381_v61 = vld [vmem:[%s4908_s1 + $0x328] sm:$0xff] }
  0x69   : > { %v389_v62 = vld [vmem:[%s4908_s1 + $0x368] sm:$0xff]  ;;  %v3367_v1 = vcombine.high %v380_v58, %v388_v59  ;;  %v3366_v7 = vcombine.low %v380_v58, %v388_v59 }
  0x6a   : > { %v3369_v2 = vcombine.high %v381_v61, %v389_v62  ;;  %v3368_v8 = vcombine.low %v381_v61, %v389_v62 }
  0x6b   : > { %2124 = vmatpush1.bf16.msra.mxu0 %v3426_v3  ;;  %2177 = vmatpush1.bf16.msra.mxu1 %v3428_v4  ;;  %v396_v3 = vld [vmem:[%s4908_s1 + $0x3a0] sm:$0xff] }
  0x6c   : > { %2125 = vmatprep.subr.bf16.mxu0 %v3443_v5  ;;  %2178 = vmatprep.subr.bf16.mxu1 %v3445_v6  ;;  %v404_v4 = vld [vmem:[%s4908_s1 + $0x3e0] sm:$0xff]  ;;  %v397_v5 = vld [vmem:[%s4908_s1 + $0x3a8] sm:$0xff] }
  0x6d   : > { %v405_v6 = vld [vmem:[%s4908_s1 + $0x3e8] sm:$0xff]  ;;  %v3383_v9 = vcombine.high %v396_v3, %v404_v4  ;;  %v3382_v15 = vcombine.low %v396_v3, %v404_v4 }
  0x6e   : > { %v3385_v10 = vcombine.high %v397_v5, %v405_v6  ;;  %v3384_v16 = vcombine.low %v397_v5, %v405_v6 }
  0x6f   : > { %2126 = vmatpush1.bf16.msra.mxu0 %v3442_v11  ;;  %2179 = vmatpush1.bf16.msra.mxu1 %v3444_v12  ;;  %v412_v11 = vld [vmem:[%s4908_s1 + $0x420] sm:$0xff] }
  0x70   : > { %2209 = vmatprep.subr.bf16.mxu0 %v3271_v13  ;;  %2262 = vmatprep.subr.bf16.mxu1 %v3273_v14  ;;  %v420_v12 = vld [vmem:[%s4908_s1 + $0x460] sm:$0xff]  ;;  %v413_v13 = vld [vmem:[%s4908_s1 + $0x428] sm:$0xff] }
  0x71   : > { %v421_v14 = vld [vmem:[%s4908_s1 + $0x468] sm:$0xff]  ;;  %v3399_v17 = vcombine.high %v412_v11, %v420_v12  ;;  %v3398_v23 = vcombine.low %v412_v11, %v420_v12 }
  0x72   : > { %2136 = vmatmul.mubr.bf16.vlgmr.msra.gmra.mrb[8].mxu0 %v3935_v41  ;;  %2189 = vmatmul.mubr.bf16.vlgmr.msra.gmra.mrb[8].mxu1 %v3935_v41  ;;  %v3401_v18 = vcombine.high %v413_v13, %v421_v14  ;;  %v3400_v24 = vcombine.low %v413_v13, %v421_v14 }
  0x73   : > { %2210 = vmatpush1.bf16.msra.mxu0 %v3270_v19  ;;  %2263 = vmatpush1.bf16.msra.mxu1 %v3272_v20  ;;  %v428_v19 = vld [vmem:[%s4908_s1 + $0x4a0] sm:$0xff] }
  0x74   : > { %2211 = vmatprep.subr.bf16.mxu0 %v3287_v21  ;;  %2264 = vmatprep.subr.bf16.mxu1 %v3289_v22  ;;  %v436_v20 = vld [vmem:[%s4908_s1 + $0x4e0] sm:$0xff]  ;;  %v429_v21 = vld [vmem:[%s4908_s1 + $0x4a8] sm:$0xff] }
  0x75   : > { %3459 = vmatprep.mubr.msk.bf16.mxu0 %vm1990_vm0, %v3944_v49  ;;  %3461 = vmatprep.mubr.msk.bf16.mxu1 %vm1990_vm0, %v3944_v49  ;;  %v437_v22 = vld [vmem:[%s4908_s1 + $0x4e8] sm:$0xff]  ;;  %v3415_v25 = vcombine.high %v428_v19, %v436_v20  ;;  %v3414_v31 = vcombine.low %v428_v19, %v436_v20 }
  0x76   : > { %v3417_v26 = vcombine.high %v429_v21, %v437_v22  ;;  %v3416_v32 = vcombine.low %v429_v21, %v437_v22 }
  0x77   : > { %2212 = vmatpush1.bf16.msra.mxu0 %v3286_v27  ;;  %2265 = vmatpush1.bf16.msra.mxu1 %v3288_v28  ;;  %v444_v27 = vld [vmem:[%s4908_s1 + $0x520] sm:$0xff] }
  0x78   : > { %2213 = vmatprep.subr.bf16.mxu0 %v3303_v29  ;;  %2266 = vmatprep.subr.bf16.mxu1 %v3305_v30  ;;  %v452_v28 = vld [vmem:[%s4908_s1 + $0x560] sm:$0xff]  ;;  %v445_v29 = vld [vmem:[%s4908_s1 + $0x528] sm:$0xff] }
  0x79   : > { %v453_v30 = vld [vmem:[%s4908_s1 + $0x568] sm:$0xff]  ;;  %v3431_v33 = vcombine.high %v444_v27, %v452_v28  ;;  %v3430_v39 = vcombine.low %v444_v27, %v452_v28 }
  0x7a   : > { %2146 = vmatmul.mubr.bf16.gmra.mrb[12].mxu0 %v3971_v60  ;;  %2199 = vmatmul.mubr.bf16.gmra.mrb[12].mxu1 %v3971_v60  ;;  %v3433_v34 = vcombine.high %v445_v29, %v453_v30  ;;  %v3432_v40 = vcombine.low %v445_v29, %v453_v30 }
  0x7b   : > { %2214 = vmatpush1.bf16.msra.mxu0 %v3302_v35  ;;  %2267 = vmatpush1.bf16.msra.mxu1 %v3304_v36  ;;  %v460_v35 = vld [vmem:[%s4908_s1 + $0x5a0] sm:$0xff] }
  0x7c   : > { %2215 = vmatprep.subr.bf16.mxu0 %v3319_v37  ;;  %2268 = vmatprep.subr.bf16.mxu1 %v3321_v38  ;;  %v468_v36 = vld [vmem:[%s4908_s1 + $0x5e0] sm:$0xff]  ;;  %v461_v37 = vld [vmem:[%s4908_s1 + $0x5a8] sm:$0xff] }
  0x7d   : > { %3462 = vmatprep.mubr.msk.bf16.mxu0 %vm1990_vm0, %v3838_v43  ;;  %3464 = vmatprep.mubr.msk.bf16.mxu1 %vm1990_vm0, %v3838_v43  ;;  %v469_v38 = vld [vmem:[%s4908_s1 + $0x5e8] sm:$0xff]  ;;  %v3447_v42 = vcombine.high %v460_v35, %v468_v36  ;;  %v3446_v50 = vcombine.low %v460_v35, %v468_v36 }
  0x7e   : > { %v3449_v44 = vcombine.high %v461_v37, %v469_v38  ;;  %v3448_v51 = vcombine.low %v461_v37, %v469_v38  ;;  %v398_v38 = vld [vmem:[%s4908_s1 + $0x3b0] sm:$0xff] }
  0x7f   : > { %2216 = vmatpush1.bf16.msra.mxu0 %v3318_v45  ;;  %2269 = vmatpush1.bf16.msra.mxu1 %v3320_v46  ;;  %v286_v45 = vld [vmem:[%s4908_s1 + $0x30] sm:$0xff] }
  0x80   : > { %2217 = vmatprep.subr.bf16.mxu0 %v3335_v47  ;;  %2270 = vmatprep.subr.bf16.mxu1 %v3337_v48  ;;  %v294_v46 = vld [vmem:[%s4908_s1 + $0x70] sm:$0xff]  ;;  %v287_v47 = vld [vmem:[%s4908_s1 + $0x38] sm:$0xff] }
  0x81   : > { %v295_v48 = vld [vmem:[%s4908_s1 + $0x78] sm:$0xff]  ;;  %v3275_v52 = vcombine.high %v286_v45, %v294_v46  ;;  %v3274_v58 = vcombine.low %v286_v45, %v294_v46 }
  0x82   : > { %v3277_v53 = vcombine.high %v287_v47, %v295_v48  ;;  %v3276_v59 = vcombine.low %v287_v47, %v295_v48  ;;  %v414_v48 = vld [vmem:[%s4908_s1 + $0x430] sm:$0xff] }
  0x83   : > { %2218 = vmatpush1.bf16.msra.mxu0 %v3334_v54  ;;  %2271 = vmatpush1.bf16.msra.mxu1 %v3336_v55  ;;  %v302_v54 = vld [vmem:[%s4908_s1 + $0xb0] sm:$0xff] }
  0x84   : > { %2219 = vmatprep.subr.bf16.mxu0 %v3351_v56  ;;  %2272 = vmatprep.subr.bf16.mxu1 %v3353_v57  ;;  %v310_v55 = vld [vmem:[%s4908_s1 + $0xf0] sm:$0xff]  ;;  %v303_v56 = vld [vmem:[%s4908_s1 + $0xb8] sm:$0xff] }
  0x85   : > { %v311_v57 = vld [vmem:[%s4908_s1 + $0xf8] sm:$0xff]  ;;  %v3291_v61 = vcombine.high %v302_v54, %v310_v55  ;;  %v3290_v3 = vcombine.low %v302_v54, %v310_v55 }
  0x86   : > { %v3293_v62 = vcombine.high %v303_v56, %v311_v57  ;;  %v3292_v4 = vcombine.low %v303_v56, %v311_v57  ;;  %v430_v57 = vld [vmem:[%s4908_s1 + $0x4b0] sm:$0xff] }
  0x87   : > { %2220 = vmatpush1.bf16.msra.mxu0 %v3350_v63  ;;  %2273 = vmatpush1.bf16.msra.mxu1 %v3352_v0  ;;  %v318_v63 = vld [vmem:[%s4908_s1 + $0x130] sm:$0xff] }
  0x88   : > { %2221 = vmatprep.subr.bf16.mxu0 %v3367_v1  ;;  %2274 = vmatprep.subr.bf16.mxu1 %v3369_v2  ;;  %v326_v0 = vld [vmem:[%s4908_s1 + $0x170] sm:$0xff]  ;;  %v319_v1 = vld [vmem:[%s4908_s1 + $0x138] sm:$0xff] }
  0x89   : > { %v327_v2 = vld [vmem:[%s4908_s1 + $0x178] sm:$0xff]  ;;  %v3307_v5 = vcombine.high %v318_v63, %v326_v0  ;;  %v3306_v11 = vcombine.low %v318_v63, %v326_v0 }
  0x8a   : > { %v3309_v6 = vcombine.high %v319_v1, %v327_v2  ;;  %v3308_v12 = vcombine.low %v319_v1, %v327_v2  ;;  %v446_v2 = vld [vmem:[%s4908_s1 + $0x530] sm:$0xff] }
  0x8b   : > { %2222 = vmatpush1.bf16.msra.mxu0 %v3366_v7  ;;  %2275 = vmatpush1.bf16.msra.mxu1 %v3368_v8  ;;  %v334_v7 = vld [vmem:[%s4908_s1 + $0x1b0] sm:$0xff] }
  0x8c   : > { %2223 = vmatprep.subr.bf16.mxu0 %v3383_v9  ;;  %2276 = vmatprep.subr.bf16.mxu1 %v3385_v10  ;;  %v342_v8 = vld [vmem:[%s4908_s1 + $0x1f0] sm:$0xff]  ;;  %v335_v9 = vld [vmem:[%s4908_s1 + $0x1b8] sm:$0xff] }
  0x8d   : > { %v343_v10 = vld [vmem:[%s4908_s1 + $0x1f8] sm:$0xff]  ;;  %v3323_v13 = vcombine.high %v334_v7, %v342_v8  ;;  %v3322_v19 = vcombine.low %v334_v7, %v342_v8 }
  0x8e   : > { %v3325_v14 = vcombine.high %v335_v9, %v343_v10  ;;  %v3324_v20 = vcombine.low %v335_v9, %v343_v10  ;;  %v462_v10 = vld [vmem:[%s4908_s1 + $0x5b0] sm:$0xff] }
  0x8f   : > { %2224 = vmatpush1.bf16.msra.mxu0 %v3382_v15  ;;  %2277 = vmatpush1.bf16.msra.mxu1 %v3384_v16  ;;  %v350_v15 = vld [vmem:[%s4908_s1 + $0x230] sm:$0xff] }
  0x90   : > { %2225 = vmatprep.subr.bf16.mxu0 %v3399_v17  ;;  %2278 = vmatprep.subr.bf16.mxu1 %v3401_v18  ;;  %v358_v16 = vld [vmem:[%s4908_s1 + $0x270] sm:$0xff]  ;;  %v351_v17 = vld [vmem:[%s4908_s1 + $0x238] sm:$0xff] }
  0x91   : > { %v359_v18 = vld [vmem:[%s4908_s1 + $0x278] sm:$0xff]  ;;  %v3339_v21 = vcombine.high %v350_v15, %v358_v16  ;;  %v3338_v27 = vcombine.low %v350_v15, %v358_v16 }
  0x92   : > { %v3341_v22 = vcombine.high %v351_v17, %v359_v18  ;;  %v3340_v28 = vcombine.low %v351_v17, %v359_v18 }
  0x93   : > { %2226 = vmatpush1.bf16.msra.mxu0 %v3398_v23  ;;  %2279 = vmatpush1.bf16.msra.mxu1 %v3400_v24  ;;  %v366_v23 = vld [vmem:[%s4908_s1 + $0x2b0] sm:$0xff] }
  0x94   : > { %2227 = vmatprep.subr.bf16.mxu0 %v3415_v25  ;;  %2280 = vmatprep.subr.bf16.mxu1 %v3417_v26  ;;  %v374_v24 = vld [vmem:[%s4908_s1 + $0x2f0] sm:$0xff]  ;;  %v367_v25 = vld [vmem:[%s4908_s1 + $0x2b8] sm:$0xff] }
  0x95   : > { %v375_v26 = vld [vmem:[%s4908_s1 + $0x2f8] sm:$0xff]  ;;  %v3355_v29 = vcombine.high %v366_v23, %v374_v24 }
  0x96   : > { %v3357_v30 = vcombine.high %v367_v25, %v375_v26  ;;  %v3356_v35 = vcombine.low %v367_v25, %v375_v26  ;;  %v4431_v26 = vld [vmem:[%s4909_s2 + $0x2] ss:$4 sm:$0xff] }
  0x97   : > { %2228 = vmatpush1.bf16.msra.mxu0 %v3414_v31  ;;  %2281 = vmatpush1.bf16.msra.mxu1 %v3416_v32  ;;  %v382_v31 = vld [vmem:[%s4908_s1 + $0x330] sm:$0xff] }
  0x98   : > { %2229 = vmatprep.subr.bf16.mxu0 %v3431_v33  ;;  %2282 = vmatprep.subr.bf16.mxu1 %v3433_v34  ;;  %v390_v32 = vld [vmem:[%s4908_s1 + $0x370] sm:$0xff]  ;;  %v391_v33 = vld [vmem:[%s4908_s1 + $0x378] sm:$0xff]  ;;  %v3354_v34 = vcombine.low %v366_v23, %v374_v24 }
  0x99   : > { %v3371_v36 = vcombine.high %v382_v31, %v390_v32 }
  0x9b   : > { %2230 = vmatpush1.bf16.msra.mxu0 %v3430_v39  ;;  %2283 = vmatpush1.bf16.msra.mxu1 %v3432_v40  ;;  %v406_v39 = vld [vmem:[%s4908_s1 + $0x3f0] sm:$0xff]  ;;  %v399_v40 = vld [vmem:[%s4908_s1 + $0x3b8] sm:$0xff] }
  0x9c   : > { %2231 = vmatprep.subr.bf16.mxu0 %v3447_v42  ;;  %2284 = vmatprep.subr.bf16.mxu1 %v3449_v44  ;;  %v407_v42 = vld [vmem:[%s4908_s1 + $0x3f8] sm:$0xff]  ;;  %v3370_v44 = vcombine.low %v382_v31, %v390_v32  ;;  %v3387_v46 = vcombine.high %v398_v38, %v406_v39 }
  0x9d   : > { %v3389_v47 = vcombine.high %v399_v40, %v407_v42  ;;  %v3388_v54 = vcombine.low %v399_v40, %v407_v42 }
  0x9f   : > { %2232 = vmatpush1.bf16.msra.mxu0 %v3446_v50  ;;  %2285 = vmatpush1.bf16.msra.mxu1 %v3448_v51  ;;  %v422_v50 = vld [vmem:[%s4908_s1 + $0x470] sm:$0xff]  ;;  %v415_v51 = vld [vmem:[%s4908_s1 + $0x438] sm:$0xff] }
  0xa0   : > { %2315 = vmatprep.subr.bf16.mxu0 %v3275_v52  ;;  %2368 = vmatprep.subr.bf16.mxu1 %v3277_v53  ;;  %v423_v52 = vld [vmem:[%s4908_s1 + $0x478] sm:$0xff]  ;;  %v3386_v53 = vcombine.low %v398_v38, %v406_v39  ;;  %v3403_v55 = vcombine.high %v414_v48, %v422_v50 }
  0xa1   : > { %v3405_v56 = vcombine.high %v415_v51, %v423_v52  ;;  %v3404_v63 = vcombine.low %v415_v51, %v423_v52 }
  0xa2   : > { %2242 = vmatmul.mubr.bf16.vlgmr.msra.gmra.mrb[16].mxu0 %v3935_v41  ;;  %2295 = vmatmul.mubr.bf16.vlgmr.msra.gmra.mrb[16].mxu1 %v3935_v41 }
  0xa3   : > { %2316 = vmatpush1.bf16.msra.mxu0 %v3274_v58  ;;  %2369 = vmatpush1.bf16.msra.mxu1 %v3276_v59  ;;  %v438_v58 = vld [vmem:[%s4908_s1 + $0x4f0] sm:$0xff]  ;;  %v431_v59 = vld [vmem:[%s4908_s1 + $0x4b8] sm:$0xff] }
  0xa4   : > { %2317 = vmatprep.subr.bf16.mxu0 %v3291_v61  ;;  %2370 = vmatprep.subr.bf16.mxu1 %v3293_v62  ;;  %v439_v61 = vld [vmem:[%s4908_s1 + $0x4f8] sm:$0xff]  ;;  %v3402_v62 = vcombine.low %v414_v48, %v422_v50  ;;  %v3419_v0 = vcombine.high %v430_v57, %v438_v58 }
  0xa5   : > { %3463 = vmatprep.mubr.msk.bf16.mxu0 %vm1990_vm0, %v3944_v49  ;;  %3465 = vmatprep.mubr.msk.bf16.mxu1 %vm1990_vm0, %v3944_v49  ;;  %v3421_v1 = vcombine.high %v431_v59, %v439_v61  ;;  %v3420_v7 = vcombine.low %v431_v59, %v439_v61 }
  0xa7   : > { %2318 = vmatpush1.bf16.msra.mxu0 %v3290_v3  ;;  %2371 = vmatpush1.bf16.msra.mxu1 %v3292_v4  ;;  %v454_v3 = vld [vmem:[%s4908_s1 + $0x570] sm:$0xff]  ;;  %v447_v4 = vld [vmem:[%s4908_s1 + $0x538] sm:$0xff] }
  0xa8   : > { %2319 = vmatprep.subr.bf16.mxu0 %v3307_v5  ;;  %2372 = vmatprep.subr.bf16.mxu1 %v3309_v6  ;;  %v455_v5 = vld [vmem:[%s4908_s1 + $0x578] sm:$0xff]  ;;  %v3418_v6 = vcombine.low %v430_v57, %v438_v58  ;;  %v3435_v8 = vcombine.high %v446_v2, %v454_v3 }
  0xa9   : > { %v3437_v9 = vcombine.high %v447_v4, %v455_v5  ;;  %v3436_v15 = vcombine.low %v447_v4, %v455_v5 }
  0xaa   : > { %2252 = vmatmul.mubr.bf16.gmra.mrb[20].mxu0 %v3971_v60  ;;  %2305 = vmatmul.mubr.bf16.gmra.mrb[20].mxu1 %v3971_v60 }
  0xab   : > { %2320 = vmatpush1.bf16.msra.mxu0 %v3306_v11  ;;  %2373 = vmatpush1.bf16.msra.mxu1 %v3308_v12  ;;  %v470_v11 = vld [vmem:[%s4908_s1 + $0x5f0] sm:$0xff]  ;;  %v463_v12 = vld [vmem:[%s4908_s1 + $0x5b8] sm:$0xff] }
  0xac   : > { %2321 = vmatprep.subr.bf16.mxu0 %v3323_v13  ;;  %2374 = vmatprep.subr.bf16.mxu1 %v3325_v14  ;;  %v471_v13 = vld [vmem:[%s4908_s1 + $0x5f8] sm:$0xff]  ;;  %v3434_v14 = vcombine.low %v446_v2, %v454_v3  ;;  %v3451_v16 = vcombine.high %v462_v10, %v470_v11  ;;  %v3450_v18 = vcombine.low %v462_v10, %v470_v11 }
  0xad   : > { %3466 = vmatprep.mubr.msk.bf16.mxu0 %vm1990_vm0, %v3838_v43  ;;  %3468 = vmatprep.mubr.msk.bf16.mxu1 %vm1990_vm0, %v3838_v43  ;;  %v383_v43 = vld [vmem:[%s4908_s1 + $0x338] sm:$0xff]  ;;  %v3453_v17 = vcombine.high %v463_v12, %v471_v13 }
  0xae   : > { %v3373_v37 = vcombine.high %v383_v43, %v391_v33  ;;  %v3372_v45 = vcombine.low %v383_v43, %v391_v33 }
  0xaf   : > { %2322 = vmatpush1.bf16.msra.mxu0 %v3322_v19  ;;  %2375 = vmatpush1.bf16.msra.mxu1 %v3324_v20  ;;  %v3452_v19 = vcombine.low %v463_v12, %v471_v13  ;;  %v473_v20 = vlaneseq }
  0xb0   : > { %2323 = vmatprep.subr.bf16.mxu0 %v3339_v21  ;;  %2376 = vmatprep.subr.bf16.mxu1 %v3341_v22 }
  0xb1   : > { %v4401_v21 = vshrl.u32 %v473_v20, 7 }
  0xb3   : > { %2324 = vmatpush1.bf16.msra.mxu0 %v3338_v27  ;;  %2377 = vmatpush1.bf16.msra.mxu1 %v3340_v28  ;;  %v4404_v22 = vsub.s32 0, %v4401_v21  ;;  %v4407_v23 = vsub.s32 2, %v4401_v21  ;;  %v4418_v24 = vsub.s32 3, %v4401_v21  ;;  %vm486_vm1 = vcmp.eq.s32.totalorder %v4401_v21, 0 }
  0xb4   : > { %2325 = vmatprep.subr.bf16.mxu0 %v3355_v29  ;;  %2378 = vmatprep.subr.bf16.mxu1 %v3357_v30  ;;  %v3665_v28 = vmov 0.0   ;;  %v477_v32 = vadd.s32 24, %v4401_v21 }
  0xb5   : > { %v4436_v29 = vsel %vm486_vm1, 1.0, %v3665_v28  ;;  %v807_v33 = vrot.slane %v4431_v26, %v4404_v22 }
  0xb6   : > { %vm793_vm2 = vcmp.eq.s32.totalorder %v477_v32, 31 }
  0xb7   : > { %2326 = vmatpush1.bf16.msra.mxu0 %v3354_v34  ;;  %2379 = vmatpush1.bf16.msra.mxu1 %v3356_v35  ;;  %v884_v51 = vmul.f32 0.0, %v807_v33  ;;  %v4464_v57 = vsel %vm793_vm2, 1.0, %v3665_v28 }
  0xb8   : > { %2327 = vmatprep.subr.bf16.mxu0 %v3371_v36  ;;  %2380 = vmatprep.subr.bf16.mxu1 %v3373_v37  ;;  %v815_v37 = vrot.slane %v4431_v26, %v4407_v23  ;;  %v4475_v2 = vmul.f32 %v807_v33, %v4464_v57 }
  0xba   : > { %v4478_v5 = vmul.f32 %v815_v37, %v4464_v57 }
  0xbb   : > { %2328 = vmatpush1.bf16.msra.mxu0 %v3370_v44  ;;  %2381 = vmatpush1.bf16.msra.mxu1 %v3372_v45  ;;  %v819_v45 = vrot.slane %v4431_v26, %v4418_v24 }
  0xbc   : > { %2329 = vmatprep.subr.bf16.mxu0 %v3387_v46  ;;  %2382 = vmatprep.subr.bf16.mxu1 %v3389_v47 }
  0xbd   : > { %v887_v59 = vmul.f32 0.0, %v819_v45 }
  0xbf   : > { %2330 = vmatpush1.bf16.msra.mxu0 %v3386_v53  ;;  %2383 = vmatpush1.bf16.msra.mxu1 %v3388_v54  ;;  %v886_v54 = vmul.f32 0.0, %v815_v37 }
  0xc0   : > { %2331 = vmatprep.subr.bf16.mxu0 %v3403_v55  ;;  %2384 = vmatprep.subr.bf16.mxu1 %v3405_v56 }
  0xc3   : > { %2332 = vmatpush1.bf16.msra.mxu0 %v3402_v62  ;;  %2385 = vmatpush1.bf16.msra.mxu1 %v3404_v63 }
  0xc4   : > { %2333 = vmatprep.subr.bf16.mxu0 %v3419_v0  ;;  %2386 = vmatprep.subr.bf16.mxu1 %v3421_v1 }
  0xc7   : > { %2334 = vmatpush1.bf16.msra.mxu0 %v3418_v6  ;;  %2387 = vmatpush1.bf16.msra.mxu1 %v3420_v7 }
  0xc8   : > { %2335 = vmatprep.subr.bf16.mxu0 %v3435_v8  ;;  %2388 = vmatprep.subr.bf16.mxu1 %v3437_v9  ;;  %v4485_v9 = vmul.f32 %v819_v45, %v4464_v57 }
  0xcb   : > { %2336 = vmatpush1.bf16.msra.mxu0 %v3434_v14  ;;  %2389 = vmatpush1.bf16.msra.mxu1 %v3436_v15 }
  0xcc   : > { %2337 = vmatprep.subr.bf16.mxu0 %v3451_v16  ;;  %2390 = vmatprep.subr.bf16.mxu1 %v3453_v17 }
  0xcf   : > { %2338 = vmatpush1.bf16.msra.mxu0 %v3450_v18  ;;  %2391 = vmatpush1.bf16.msra.mxu1 %v3452_v19 }
  0xd2   : > { %2348 = vmatmul.mubr.bf16.vlgmr.msra.gmra.mrb[24].mxu0 %v3935_v41  ;;  %2401 = vmatmul.mubr.bf16.vlgmr.msra.gmra.mrb[24].mxu1 %v3935_v41  ;;  %v4412_v41 = vld [vmem:[%s4909_s2 + $0x1] ss:$4 sm:$0xff] }
  0xd3   : > { %3467 = vmatprep.mubr.msk.bf16.mxu0 %vm1990_vm0, %v3944_v49  ;;  %3469 = vmatprep.mubr.msk.bf16.mxu1 %vm1990_vm0, %v3944_v49  ;;  %v4415_v49 = vsub.s32 1, %v4401_v21  ;;  %v503_v25 = vrot.slane %v4412_v41, %v4404_v22  ;;  %v511_v27 = vrot.slane %v4412_v41, %v4407_v23  ;;  %v515_v31 = vrot.slane %v4412_v41, %v4418_v24 }
  0xd5   : > { %v507_v30 = vrot.slane %v4412_v41, %v4415_v49  ;;  %v580_v34 = vmul.f32 %v503_v25, %v4436_v29  ;;  %v582_v35 = vmul.f32 %v511_v27, %v4436_v29  ;;  %v811_v40 = vrot.slane %v4431_v26, %v4415_v49 }
  0xd6   : > { %v583_v42 = vmul.f32 %v515_v31, %v4436_v29  ;;  %v596_v46 = vmul.f32 0.0, %v503_v25  ;;  %v598_v47 = vmul.f32 0.0, %v511_v27  ;;  %v599_v53 = vmul.f32 0.0, %v515_v31 }
  0xd7   : > { %v581_v38 = vmul.f32 %v507_v30, %v4436_v29  ;;  %v597_v48 = vmul.f32 0.0, %v507_v30  ;;  %v885_v56 = vmul.f32 0.0, %v811_v40  ;;  %v4481_v6 = vmul.f32 %v811_v40, %v4464_v57 }
  0xda   : > { %2358 = vmatmul.mubr.bf16.gmra.mrb[28].mxu0 %v3971_v60  ;;  %2411 = vmatmul.mubr.bf16.gmra.mrb[28].mxu1 %v3971_v60  ;;  %v4424_v60 = vld [vmem:[%s4909_s2] ss:$4 sm:$0xff] }
  0xdb   : > { %v649_v43 = vrot.slane %v4424_v60, %v4404_v22  ;;  %v657_v36 = vrot.slane %v4424_v60, %v4407_v23  ;;  %v653_v39 = vrot.slane %v4424_v60, %v4415_v49  ;;  %v661_v44 = vrot.slane %v4424_v60, %v4418_v24  ;;  %3500 = vmatprep.mubr.msk.f32.mxu0 %vm3669_vm3, %v3665_v28 }
  0xdd   : > { %v726_v50 = vsub.f32 %v649_v43, %v580_v34  ;;  %v728_v52 = vsub.f32 %v657_v36, %v582_v35  ;;  %v727_v55 = vsub.f32 %v653_v39, %v581_v38  ;;  %v729_v58 = vsub.f32 %v661_v44, %v583_v42 }
  0xde   : > { %v4466_v61 = vsub.f32 %v649_v43, %v596_v46  ;;  %v4468_v62 = vsub.f32 %v657_v36, %v598_v47  ;;  %v4470_v63 = vsub.f32 %v653_v39, %v597_v48  ;;  %v4472_v1 = vsub.f32 %v661_v44, %v599_v53 }
  0xdf   : > { %v948_v0 = vsub.f32 %v726_v50, %v884_v51  ;;  %v950_v3 = vsub.f32 %v728_v52, %v886_v54  ;;  %v949_v4 = vsub.f32 %v727_v55, %v885_v56  ;;  %v951_v7 = vsub.f32 %v729_v58, %v887_v59 }
  0xe0   : > { %v964_v8 = vsub.f32 %v4466_v61, %v884_v51  ;;  %v966_v11 = vsub.f32 %v4468_v62, %v886_v54  ;;  %v965_v12 = vsub.f32 %v4470_v63, %v885_v56  ;;  %v967_v16 = vsub.f32 %v4472_v1, %v887_v59 }
  0xe1   : > { %v996_v17 = vsub.f32 %v4466_v61, %v4475_v2  ;;  %v998_v27 = vsub.f32 %v4468_v62, %v4478_v5  ;;  %v997_v30 = vsub.f32 %v4470_v63, %v4481_v6  ;;  %v999_v35 = vsub.f32 %v4472_v1, %v4485_v9 }
 0x115   : > { %v2031_v10 = vpop.f32.mrb[0].mxu0  ;;  %v2084_v14 = vpop.f32.mrb[0].mxu1 }
 0x116   : > { %v2032_v13 = vadd.f32 %v2031_v10, %v948_v0  ;;  %v2033_v15 = vpop.f32.mrb[1].mxu0  ;;  %v2085_v18 = vadd.f32 %v2084_v14, %v950_v3  ;;  %v2086_v20 = vpop.f32.mrb[1].mxu1 }
 0x117   : > { %v2034_v19 = vadd.f32 %v2033_v15, %v949_v4  ;;  %v2035_v25 = vpop.f32.mrb[2].mxu0  ;;  %v2087_v32 = vadd.f32 %v2086_v20, %v951_v7  ;;  %v2088_v33 = vpop.f32.mrb[2].mxu1 }
 0x118   : > { %v2421_v31 = vmax.f32 %v2032_v13, 1e-06  ;;  %v2036_v43 = vadd.f32 %v2035_v25, %v964_v8  ;;  %v2037_v34 = vpop.f32.mrb[3].mxu0  ;;  %v2423_v36 = vmax.f32 %v2085_v18, 1e-06  ;;  %v2089_v38 = vadd.f32 %v2088_v33, %v966_v11  ;;  %v2090_v40 = vpop.f32.mrb[3].mxu1 }
 0x119   : > { %v2422_v37 = vmax.f32 %v2034_v19, 1e-06  ;;  %v2038_v39 = vadd.f32 %v2037_v34, %v965_v12  ;;  %v2424_v44 = vmax.f32 %v2087_v32, 1e-06  ;;  %v2091_v46 = vadd.f32 %v2090_v40, %v967_v16 }
 0x11a   : > { %v2485_v42 = vmul.f32 %v2421_v31, %v2421_v31  ;;  %v2437_v45 = vmax.f32 %v2036_v43, 1e-06  ;;  %v2487_v47 = vmul.f32 %v2423_v36, %v2423_v36  ;;  %v2439_v50 = vmax.f32 %v2089_v38, 1e-06 }
 0x11b   : > { %v2486_v48 = vmul.f32 %v2422_v37, %v2422_v37  ;;  %v2438_v51 = vmax.f32 %v2038_v39, 1e-06  ;;  %v2488_v53 = vmul.f32 %v2424_v44, %v2424_v44  ;;  %v2440_v55 = vmax.f32 %v2091_v46, 1e-06 }
 0x11c   : > { %v2549_v52 = vmul.f32 %v2485_v42, %v2421_v31  ;;  %v2501_v54 = vmul.f32 %v2437_v45, %v2437_v45  ;;  %v2551_v56 = vmul.f32 %v2487_v47, %v2423_v36  ;;  %v2503_v59 = vmul.f32 %v2439_v50, %v2439_v50 }
 0x11d   : > { %v2550_v58 = vmul.f32 %v2486_v48, %v2422_v37  ;;  %v2502_v61 = vmul.f32 %v2438_v51, %v2438_v51  ;;  %v2041_v62 = vpop.f32.mrb[4].mxu0  ;;  %v2552_v63 = vmul.f32 %v2488_v53, %v2424_v44  ;;  %v2504_v1 = vmul.f32 %v2440_v55, %v2440_v55  ;;  %v2094_v3 = vpop.f32.mrb[4].mxu1 }
 0x11e   : > { %v2565_v0 = vmul.f32 %v2501_v54, %v2437_v45  ;;  %v2042_v2 = vadd.f32 %v2041_v62, %v964_v8  ;;  %v2043_v4 = vpop.f32.mrb[5].mxu0  ;;  %v2567_v5 = vmul.f32 %v2503_v59, %v2439_v50  ;;  %v2095_v7 = vadd.f32 %v2094_v3, %v966_v11  ;;  %v2096_v10 = vpop.f32.mrb[5].mxu1 }
 0x11f   : > { %v2566_v6 = vmul.f32 %v2502_v61, %v2438_v51  ;;  %v2044_v9 = vadd.f32 %v2043_v4, %v965_v12  ;;  %v2045_v13 = vpop.f32.mrb[6].mxu0  ;;  %v2568_v15 = vmul.f32 %v2504_v1, %v2440_v55  ;;  %v2097_v19 = vadd.f32 %v2096_v10, %v967_v16  ;;  %v2098_v20 = vpop.f32.mrb[6].mxu1 }
 0x120   : > { %v2691_v14 = vadd.f32 %v2565_v0, %v2549_v52  ;;  %v2453_v18 = vmax.f32 %v2042_v2, 1e-06  ;;  %v2047_v25 = vpop.f32.mrb[7].mxu0  ;;  %v2709_v31 = vadd.f32 %v2567_v5, %v2551_v56  ;;  %v2455_v43 = vmax.f32 %v2095_v7, 1e-06  ;;  %v2100_v34 = vpop.f32.mrb[7].mxu1 }
 0x121   : > { %v2700_v32 = vadd.f32 %v2566_v6, %v2550_v58  ;;  %v2454_v33 = vmax.f32 %v2044_v9, 1e-06  ;;  %v2718_v8 = vadd.f32 %v2568_v15, %v2552_v63  ;;  %v2456_v37 = vmax.f32 %v2097_v19, 1e-06 }
 0x122   : > { %v2517_v36 = vmul.f32 %v2453_v18, %v2453_v18  ;;  %v2046_v38 = vadd.f32 %v2045_v13, %v996_v17  ;;  %v2519_v39 = vmul.f32 %v2455_v43, %v2455_v43  ;;  %v2099_v12 = vadd.f32 %v2098_v20, %v998_v27 }
 0x123   : > { %v2518_v11 = vmul.f32 %v2454_v33, %v2454_v33  ;;  %v2048_v40 = vadd.f32 %v2047_v25, %v997_v30  ;;  %v2520_v44 = vmul.f32 %v2456_v37, %v2456_v37  ;;  %v2101_v46 = vadd.f32 %v2100_v34, %v999_v35 }
 0x124   : > { %v2581_v42 = vmul.f32 %v2517_v36, %v2453_v18  ;;  %v2469_v45 = vmax.f32 %v2046_v38, 1e-06  ;;  %v2583_v16 = vmul.f32 %v2519_v39, %v2455_v43  ;;  %v2471_v48 = vmax.f32 %v2099_v12, 1e-06 }
 0x125   : > { %v2582_v47 = vmul.f32 %v2518_v11, %v2454_v33  ;;  %v2470_v50 = vmax.f32 %v2048_v40, 1e-06  ;;  %v2584_v52 = vmul.f32 %v2520_v44, %v2456_v37  ;;  %v2472_v54 = vmax.f32 %v2101_v46, 1e-06 }
 0x126   : > { %v2692_v51 = vadd.f32 %v2691_v14, %v2581_v42  ;;  %v2533_v53 = vmul.f32 %v2469_v45, %v2469_v45  ;;  %v2710_v55 = vadd.f32 %v2709_v31, %v2583_v16  ;;  %v2535_v58 = vmul.f32 %v2471_v48, %v2471_v48 }
 0x127   : > { %v2701_v56 = vadd.f32 %v2700_v32, %v2582_v47  ;;  %v2534_v17 = vmul.f32 %v2470_v50, %v2470_v50  ;;  %v2719_v59 = vadd.f32 %v2718_v8, %v2584_v52  ;;  %v2536_v27 = vmul.f32 %v2472_v54, %v2472_v54 }
 0x128   : > { %v2597_v61 = vmul.f32 %v2533_v53, %v2469_v45  ;;  %v2599_v30 = vmul.f32 %v2535_v58, %v2471_v48  ;;  %v3666_v13 = vmov 1966171168   ;;  %v4499_v25 = vsub.s32 4, %v4401_v21 }
 0x129   : > { %v2598_v62 = vmul.f32 %v2534_v17, %v2470_v50  ;;  %v2600_v0 = vmul.f32 %v2536_v27, %v2472_v54  ;;  %v2856_v14 = vunpack.c.l.s4 %v3666_v13  ;;  %v4502_v31 = vsub.s32 6, %v4401_v21 }
 0x12a   : > { %v2693_v63 = vadd.f32 %v2692_v51, %v2597_v61  ;;  %v2711_v35 = vadd.f32 %v2710_v55, %v2599_v30  ;;  %v4505_v33 = vsub.s32 5, %v4401_v21  ;;  %v4508_v37 = vsub.s32 7, %v4401_v21 }
 0x12b   : > { %v2702_v1 = vadd.f32 %v2701_v56, %v2598_v62  ;;  %v2720_v3 = vadd.f32 %v2719_v59, %v2600_v0  ;;  %v2857_v36 = vunpack.c.0.s8 %v2856_v14  ;;  %v519_v40 = vrot.slane %v4412_v41, %v4499_v25 }
 0x12c   : > { %v2694_v2 = vrot.slane %v2693_v63, 4  ;;  %v2712_v4 = vrot.slane %v2711_v35, 4  ;;  %v527_v42 = vrot.slane %v4412_v41, %v4502_v31  ;;  %v523_v46 = vrot.slane %v4412_v41, %v4505_v33 }
 0x12d   : > { %v2703_v5 = vrot.slane %v2702_v1, 4  ;;  %v2721_v7 = vrot.slane %v2720_v3, 4  ;;  %v4517_v48 = vsub.s32 %v2857_v36, %v4401_v21  ;;  %v531_v50 = vrot.slane %v4412_v41, %v4508_v37 }
 0x12e   : > { %v2695_v6 = vadd.f32 %v2694_v2, %v2693_v63  ;;  %v2713_v9 = vadd.f32 %v2712_v4, %v2711_v35  ;;  %v665_v52 = vrot.slane %v4424_v60, %v4499_v25  ;;  %v584_v54 = vmul.f32 %v519_v40, %v4436_v29 }
 0x12f   : > { %v2704_v10 = vadd.f32 %v2703_v5, %v2702_v1  ;;  %v2722_v18 = vadd.f32 %v2721_v7, %v2720_v3  ;;  %v823_v55 = vrot.slane %v4431_v26, %v4499_v25  ;;  %v586_v56 = vmul.f32 %v527_v42, %v4436_v29 }
 0x130   : > { %v2696_v15 = vrot.slane %v2695_v6, 2  ;;  %v2714_v19 = vrot.slane %v2713_v9, 2  ;;  %v673_v21 = vrot.slane %v4424_v60, %v4502_v31  ;;  %v831_v17 = vrot.slane %v4431_v26, %v4502_v31 }
 0x131   : > { %v2705_v20 = vrot.slane %v2704_v10, 2  ;;  %v2723_v43 = vrot.slane %v2722_v18, 2  ;;  %v585_v41 = vmul.f32 %v523_v46, %v4436_v29  ;;  %v669_v61 = vrot.slane %v4424_v60, %v4505_v33 }
 0x132   : > { %v2697_v32 = vadd.f32 %v2696_v15, %v2695_v6  ;;  %v2715_v34 = vadd.f32 %v2714_v19, %v2713_v9  ;;  %v827_v27 = vrot.slane %v4431_v26, %v4505_v33  ;;  %v587_v30 = vmul.f32 %v531_v50, %v4436_v29 }
 0x133   : > { %v2706_v8 = vadd.f32 %v2705_v20, %v2704_v10  ;;  %v2724_v39 = vadd.f32 %v2723_v43, %v2722_v18  ;;  %v677_v63 = vrot.slane %v4424_v60, %v4508_v37  ;;  %v835_v0 = vrot.slane %v4431_v26, %v4508_v37 }
 0x134   : > { %v2698_v38 = vrot.slane %v2697_v32, 1  ;;  %v2716_v11 = vrot.slane %v2715_v34, 1  ;;  %v600_v35 = vmul.f32 0.0, %v519_v40  ;;  %v602_v1 = vmul.f32 0.0, %v527_v42 }
 0x135   : > { %v2707_v12 = vrot.slane %v2706_v8, 1  ;;  %v2725_v45 = vrot.slane %v2724_v39, 1  ;;  %v601_v2 = vmul.f32 0.0, %v523_v46  ;;  %v730_v4 = vsub.f32 %v665_v52, %v584_v54 }
 0x136   : > { %v2699_v44 = vadd.f32 %v2698_v38, %v2697_v32  ;;  %v2717_v16 = vadd.f32 %v2716_v11, %v2715_v34  ;;  %v888_v5 = vmul.f32 0.0, %v823_v55  ;;  %v603_v6 = vmul.f32 0.0, %v531_v50 }
 0x137   : > { %v2708_v47 = vadd.f32 %v2707_v12, %v2706_v8  ;;  %v2726_v51 = vadd.f32 %v2725_v45, %v2724_v39  ;;  %v732_v7 = vsub.f32 %v673_v21, %v586_v56  ;;  %v890_v9 = vmul.f32 0.0, %v831_v17 }
 0x138   : > { %v731_v10 = vsub.f32 %v669_v61, %v585_v41  ;;  %v889_v13 = vmul.f32 0.0, %v827_v27  ;;  %v733_v14 = vsub.f32 %v677_v63, %v587_v30  ;;  %v891_v15 = vmul.f32 0.0, %v835_v0 }
 0x139   : > { %v2851_v53 = vcombine.low %v2699_v44, %v2708_v47  ;;  %v2852_v58 = vcombine.low %v2717_v16, %v2726_v51  ;;  %v4549_v18 = vsub.f32 %v665_v52, %v600_v35  ;;  %v4551_v60 = vsub.f32 %v673_v21, %v602_v1 }
 0x13a   : > { %v4553_v26 = vsub.f32 %v669_v61, %v601_v2  ;;  %v952_v19 = vsub.f32 %v730_v4, %v888_v5  ;;  %v4555_v20 = vsub.f32 %v677_v63, %v603_v6  ;;  %v4558_v32 = vmul.f32 %v823_v55, %v4464_v57 }
 0x13b   : > { %v4533_v59 = vrot.slane %v2851_v53, %v4517_v48  ;;  %v4541_v62 = vrot.slane %v2852_v58, %v4517_v48  ;;  %v954_v43 = vsub.f32 %v732_v7, %v890_v9  ;;  %v953_v34 = vsub.f32 %v731_v10, %v889_v13 }
 0x13c   : > { %v4561_v8 = vmul.f32 %v831_v17, %v4464_v57  ;;  %v4564_v36 = vmul.f32 %v827_v27, %v4464_v57  ;;  %v955_v38 = vsub.f32 %v733_v14, %v891_v15  ;;  %v968_v39 = vsub.f32 %v4549_v18, %v888_v5 }
 0x13d   : > { %v2883_v3 = vcombine.low %v4533_v59, %v4541_v62  ;;  %v4568_v11 = vmul.f32 %v835_v0, %v4464_v57  ;;  %v970_v40 = vsub.f32 %v4551_v60, %v890_v9  ;;  %v969_v42 = vsub.f32 %v4553_v26, %v889_v13 }
 0x13e   : > { %v971_v16 = vsub.f32 %v4555_v20, %v891_v15  ;;  %v1000_v47 = vsub.f32 %v4549_v18, %v4558_v32  ;;  %v1002_v54 = vsub.f32 %v4551_v60, %v4561_v8  ;;  %v1001_v55 = vsub.f32 %v4553_v26, %v4564_v36 }
 0x13f   : > { %v1003_v61 = vsub.f32 %v4555_v20, %v4568_v11 }
 0x145   : > { %v2137_v12 = vpop.f32.mrb[8].mxu0  ;;  %v2190_v45 = vpop.f32.mrb[8].mxu1 }
 0x146   : > { %v2138_v44 = vadd.f32 %v2137_v12, %v952_v19  ;;  %v2139_v46 = vpop.f32.mrb[9].mxu0  ;;  %v2191_v50 = vadd.f32 %v2190_v45, %v954_v43  ;;  %v2192_v52 = vpop.f32.mrb[9].mxu1 }
 0x147   : > { %v2140_v51 = vadd.f32 %v2139_v46, %v953_v34  ;;  %v2141_v53 = vpop.f32.mrb[10].mxu0  ;;  %v2193_v58 = vadd.f32 %v2192_v52, %v955_v38  ;;  %v2194_v17 = vpop.f32.mrb[10].mxu1 }
 0x148   : > { %v2425_v56 = vmax.f32 %v2138_v44, 1e-06  ;;  %v2142_v21 = vadd.f32 %v2141_v53, %v968_v39  ;;  %v2143_v41 = vpop.f32.mrb[11].mxu0  ;;  %v2427_v27 = vmax.f32 %v2191_v50, 1e-06  ;;  %v2195_v63 = vadd.f32 %v2194_v17, %v970_v40  ;;  %v2196_v35 = vpop.f32.mrb[11].mxu1 }
 0x149   : > { %v2426_v30 = vmax.f32 %v2140_v51, 1e-06  ;;  %v2144_v0 = vadd.f32 %v2143_v41, %v969_v42  ;;  %v2428_v2 = vmax.f32 %v2193_v58, 1e-06  ;;  %v2197_v5 = vadd.f32 %v2196_v35, %v971_v16 }
 0x14a   : > { %v2489_v1 = vmul.f32 %v2425_v56, %v2425_v56  ;;  %v2441_v4 = vmax.f32 %v2142_v21, 1e-06  ;;  %v2491_v6 = vmul.f32 %v2427_v27, %v2427_v27  ;;  %v2443_v9 = vmax.f32 %v2195_v63, 1e-06 }
 0x14b   : > { %v2490_v7 = vmul.f32 %v2426_v30, %v2426_v30  ;;  %v2442_v10 = vmax.f32 %v2144_v0, 1e-06  ;;  %v2492_v14 = vmul.f32 %v2428_v2, %v2428_v2  ;;  %v2444_v18 = vmax.f32 %v2197_v5, 1e-06 }
 0x14c   : > { %v2553_v13 = vmul.f32 %v2489_v1, %v2425_v56  ;;  %v2505_v15 = vmul.f32 %v2441_v4, %v2441_v4  ;;  %v2555_v60 = vmul.f32 %v2491_v6, %v2427_v27  ;;  %v2507_v19 = vmul.f32 %v2443_v9, %v2443_v9 }
 0x14d   : > { %v2554_v26 = vmul.f32 %v2490_v7, %v2426_v30  ;;  %v2506_v20 = vmul.f32 %v2442_v10, %v2442_v10  ;;  %v2147_v32 = vpop.f32.mrb[12].mxu0  ;;  %v2556_v43 = vmul.f32 %v2492_v14, %v2428_v2  ;;  %v2508_v8 = vmul.f32 %v2444_v18, %v2444_v18  ;;  %v2200_v38 = vpop.f32.mrb[12].mxu1 }
 0x14e   : > { %v2569_v34 = vmul.f32 %v2505_v15, %v2441_v4  ;;  %v2148_v36 = vadd.f32 %v2147_v32, %v968_v39  ;;  %v2149_v11 = vpop.f32.mrb[13].mxu0  ;;  %v2571_v12 = vmul.f32 %v2507_v19, %v2443_v9  ;;  %v2201_v45 = vadd.f32 %v2200_v38, %v970_v40  ;;  %v2202_v50 = vpop.f32.mrb[13].mxu1 }
 0x14f   : > { %v2570_v44 = vmul.f32 %v2506_v20, %v2442_v10  ;;  %v2150_v46 = vadd.f32 %v2149_v11, %v969_v42  ;;  %v2151_v51 = vpop.f32.mrb[14].mxu0  ;;  %v2572_v53 = vmul.f32 %v2508_v8, %v2444_v18  ;;  %v2203_v58 = vadd.f32 %v2202_v50, %v971_v16  ;;  %v2204_v21 = vpop.f32.mrb[14].mxu1 }
 0x150   : > { %v2727_v52 = vadd.f32 %v2569_v34, %v2553_v13  ;;  %v2457_v56 = vmax.f32 %v2148_v36, 1e-06  ;;  %v2153_v17 = vpop.f32.mrb[15].mxu0  ;;  %v2745_v41 = vadd.f32 %v2571_v12, %v2555_v60  ;;  %v2459_v30 = vmax.f32 %v2201_v45, 1e-06  ;;  %v2206_v0 = vpop.f32.mrb[15].mxu1 }
 0x151   : > { %v2736_v27 = vadd.f32 %v2570_v44, %v2554_v26  ;;  %v2458_v63 = vmax.f32 %v2150_v46, 1e-06  ;;  %v2754_v39 = vadd.f32 %v2572_v53, %v2556_v43  ;;  %v2460_v1 = vmax.f32 %v2203_v58, 1e-06 }
 0x152   : > { %v2521_v35 = vmul.f32 %v2457_v56, %v2457_v56  ;;  %v2152_v2 = vadd.f32 %v2151_v51, %v1000_v47  ;;  %v2523_v4 = vmul.f32 %v2459_v30, %v2459_v30  ;;  %v2205_v42 = vadd.f32 %v2204_v21, %v1002_v54 }
 0x153   : > { %v2522_v40 = vmul.f32 %v2458_v63, %v2458_v63  ;;  %v2154_v5 = vadd.f32 %v2153_v17, %v1001_v55  ;;  %v2524_v7 = vmul.f32 %v2460_v1, %v2460_v1  ;;  %v2207_v10 = vadd.f32 %v2206_v0, %v1003_v61 }
 0x154   : > { %v2585_v6 = vmul.f32 %v2521_v35, %v2457_v56  ;;  %v2473_v9 = vmax.f32 %v2152_v2, 1e-06  ;;  %v2587_v16 = vmul.f32 %v2523_v4, %v2459_v30  ;;  %v2475_v14 = vmax.f32 %v2205_v42, 1e-06  ;;  %v4591_v42 = vld [vmem:[%s4909_s2 + $0x20] ss:$4 sm:$0xff] }
 0x155   : > { %v2586_v13 = vmul.f32 %v2522_v40, %v2458_v63  ;;  %v2474_v15 = vmax.f32 %v2154_v5, 1e-06  ;;  %v2588_v60 = vmul.f32 %v2524_v7, %v2460_v1  ;;  %v2476_v19 = vmax.f32 %v2207_v10, 1e-06 }
 0x156   : > { %v2728_v18 = vadd.f32 %v2727_v52, %v2585_v6  ;;  %v2537_v26 = vmul.f32 %v2473_v9, %v2473_v9  ;;  %v2746_v20 = vadd.f32 %v2745_v41, %v2587_v16  ;;  %v2539_v43 = vmul.f32 %v2475_v14, %v2475_v14 }
 0x157   : > { %v2737_v32 = vadd.f32 %v2736_v27, %v2586_v13  ;;  %v2538_v47 = vmul.f32 %v2474_v15, %v2474_v15  ;;  %v2755_v34 = vadd.f32 %v2754_v39, %v2588_v60  ;;  %v2540_v54 = vmul.f32 %v2476_v19, %v2476_v19  ;;  %v4584_v27 = vld [vmem:[%s4909_s2 + $0x21] ss:$4 sm:$0xff] }
 0x158   : > { %v2601_v8 = vmul.f32 %v2537_v26, %v2473_v9  ;;  %v2603_v55 = vmul.f32 %v2539_v43, %v2475_v14  ;;  %v535_v2 = vrot.slane %v4584_v27, %v4404_v22  ;;  %v543_v5 = vrot.slane %v4584_v27, %v4407_v23  ;;  %v4598_v9 = vld [vmem:[%s4909_s2 + $0x22] ss:$4 sm:$0xff] }
 0x159   : > { %v2602_v36 = vmul.f32 %v2538_v47, %v2474_v15  ;;  %v2604_v11 = vmul.f32 %v2540_v54, %v2476_v19  ;;  %v539_v10 = vrot.slane %v4584_v27, %v4415_v49  ;;  %v547_v14 = vrot.slane %v4584_v27, %v4418_v24 }
 0x15a   : > { %v2729_v38 = vadd.f32 %v2728_v18, %v2601_v8  ;;  %v2747_v61 = vadd.f32 %v2746_v20, %v2603_v55  ;;  %v588_v18 = vmul.f32 %v535_v2, %v4436_v29  ;;  %v681_v60 = vrot.slane %v4591_v42, %v4404_v22 }
 0x15b   : > { %v2738_v12 = vadd.f32 %v2737_v32, %v2602_v36  ;;  %v2756_v45 = vadd.f32 %v2755_v34, %v2604_v11  ;;  %v839_v19 = vrot.slane %v4598_v9, %v4404_v22  ;;  %v590_v20 = vmul.f32 %v543_v5, %v4436_v29 }
 0x15c   : > { %v2730_v44 = vrot.slane %v2729_v38, 4  ;;  %v2748_v46 = vrot.slane %v2747_v61, 4  ;;  %v689_v32 = vrot.slane %v4591_v42, %v4407_v23  ;;  %v847_v47 = vrot.slane %v4598_v9, %v4407_v23 }
 0x15d   : > { %v2739_v50 = vrot.slane %v2738_v12, 4  ;;  %v2757_v52 = vrot.slane %v2756_v45, 4  ;;  %v589_v34 = vmul.f32 %v539_v10, %v4436_v29  ;;  %v685_v8 = vrot.slane %v4591_v42, %v4415_v49 }
 0x15e   : > { %v2731_v51 = vadd.f32 %v2730_v44, %v2729_v38  ;;  %v2749_v53 = vadd.f32 %v2748_v46, %v2747_v61  ;;  %v843_v55 = vrot.slane %v4598_v9, %v4415_v49  ;;  %v591_v22 = vmul.f32 %v547_v14, %v4436_v29 }
 0x15f   : > { %v2740_v56 = vadd.f32 %v2739_v50, %v2738_v12  ;;  %v2758_v21 = vadd.f32 %v2757_v52, %v2756_v45  ;;  %v693_v36 = vrot.slane %v4591_v42, %v4418_v24  ;;  %v851_v23 = vrot.slane %v4598_v9, %v4418_v24 }
 0x160   : > { %v2732_v58 = vrot.slane %v2731_v51, 2  ;;  %v2750_v17 = vrot.slane %v2749_v53, 2  ;;  %v604_v11 = vmul.f32 0.0, %v535_v2  ;;  %v734_v61 = vsub.f32 %v681_v60, %v588_v18 }
 0x161   : > { %v2741_v41 = vrot.slane %v2740_v56, 2  ;;  %v2759_v63 = vrot.slane %v2758_v21, 2  ;;  %v606_v12 = vmul.f32 0.0, %v543_v5  ;;  %v605_v44 = vmul.f32 0.0, %v539_v10 }
 0x162   : > { %v2733_v30 = vadd.f32 %v2732_v58, %v2731_v51  ;;  %v2751_v0 = vadd.f32 %v2750_v17, %v2749_v53  ;;  %v892_v46 = vmul.f32 0.0, %v839_v19  ;;  %v736_v50 = vsub.f32 %v689_v32, %v590_v20 }
 0x163   : > { %v2742_v39 = vadd.f32 %v2741_v41, %v2740_v56  ;;  %v2760_v1 = vadd.f32 %v2759_v63, %v2758_v21  ;;  %v607_v51 = vmul.f32 0.0, %v547_v14  ;;  %v894_v52 = vmul.f32 0.0, %v847_v47 }
 0x164   : > { %v2734_v35 = vrot.slane %v2733_v30, 1  ;;  %v2752_v4 = vrot.slane %v2751_v0, 1  ;;  %v735_v49 = vsub.f32 %v685_v8, %v589_v34  ;;  %v893_v53 = vmul.f32 0.0, %v843_v55 }
 0x165   : > { %v2743_v40 = vrot.slane %v2742_v39, 1  ;;  %v2761_v7 = vrot.slane %v2760_v1, 1  ;;  %v737_v56 = vsub.f32 %v693_v36, %v591_v22  ;;  %v2891_v58 = vrot.slane %v2883_v3, %v4517_v48 }
 0x166   : > { %v2735_v6 = vadd.f32 %v2734_v35, %v2733_v30  ;;  %v2753_v16 = vadd.f32 %v2752_v4, %v2751_v0  ;;  %v895_v24 = vmul.f32 0.0, %v851_v23  ;;  %v4631_v17 = vsub.f32 %v681_v60, %v604_v11 }
 0x167   : > { %v2744_v13 = vadd.f32 %v2743_v40, %v2742_v39  ;;  %v2762_v15 = vadd.f32 %v2761_v7, %v2760_v1  ;;  %v4633_v41 = vsub.f32 %v689_v32, %v606_v12  ;;  %v4635_v30 = vsub.f32 %v685_v8, %v605_v44 }
 0x168   : > { %v956_v0 = vsub.f32 %v734_v61, %v892_v46  ;;  %v4637_v39 = vsub.f32 %v693_v36, %v607_v51  ;;  %v4640_v35 = vmul.f32 %v839_v19, %v4464_v57  ;;  %v958_v1 = vsub.f32 %v736_v50, %v894_v52 }
 0x169   : > { %v2853_v26 = vcombine.low %v2735_v6, %v2744_v13  ;;  %v2854_v43 = vcombine.low %v2753_v16, %v2762_v15  ;;  %v957_v2 = vsub.f32 %v735_v49, %v893_v53  ;;  %v4643_v59 = vmul.f32 %v847_v47, %v4464_v57 }
 0x16a   : > { %v4646_v62 = vmul.f32 %v843_v55, %v4464_v57  ;;  %v959_v3 = vsub.f32 %v737_v56, %v895_v24  ;;  %v972_v4 = vsub.f32 %v4631_v17, %v892_v46  ;;  %v4650_v40 = vmul.f32 %v851_v23, %v4464_v57 }
 0x16b   : > { %v2875_v54 = vrot.slane %v2853_v26, %v4517_v48  ;;  %v2882_v38 = vrot.slane %v2854_v43, %v4517_v48  ;;  %v974_v6 = vsub.f32 %v4633_v41, %v894_v52  ;;  %v973_v7 = vsub.f32 %v4635_v30, %v893_v53 }
 0x16c   : > { %v975_v14 = vsub.f32 %v4637_v39, %v895_v24  ;;  %v1004_v15 = vsub.f32 %v4631_v17, %v4640_v35  ;;  %v1006_v20 = vsub.f32 %v4633_v41, %v4643_v59  ;;  %v1005_v32 = vsub.f32 %v4635_v30, %v4646_v62 }
 0x16d   : > { %v2884_v45 = vcombine.low %v2875_v54, %v2882_v38  ;;  %v1007_v55 = vsub.f32 %v4637_v39, %v4650_v40 }
 0x16f   : > { %v2898_v21 = vrot.slane %v2884_v45, %v4517_v48 }
 0x171   : > { %v2899_v63 = vcombine.low %v2891_v58, %v2898_v21 }
 0x173   : > { %2953 = vst [vmem:[#allocation2] sm:$0xff] %v2899_v63 }
 0x175   : > { %v2243_v5 = vpop.f32.mrb[16].mxu0  ;;  %v2296_v16 = vpop.f32.mrb[16].mxu1 }
 0x176   : > { %v2244_v10 = vadd.f32 %v2243_v5, %v956_v0  ;;  %v2245_v13 = vpop.f32.mrb[17].mxu0  ;;  %v2297_v18 = vadd.f32 %v2296_v16, %v958_v1  ;;  %v2298_v26 = vpop.f32.mrb[17].mxu1 }
 0x177   : > { %v2246_v60 = vadd.f32 %v2245_v13, %v957_v2  ;;  %v2247_v19 = vpop.f32.mrb[18].mxu0  ;;  %v2299_v47 = vadd.f32 %v2298_v26, %v959_v3  ;;  %v2300_v8 = vpop.f32.mrb[18].mxu1 }
 0x178   : > { %v2429_v43 = vmax.f32 %v2244_v10, 1e-06  ;;  %v2248_v34 = vadd.f32 %v2247_v19, %v972_v4  ;;  %v2249_v54 = vpop.f32.mrb[19].mxu0  ;;  %v2431_v22 = vmax.f32 %v2297_v18, 1e-06  ;;  %v2301_v38 = vadd.f32 %v2300_v8, %v974_v6  ;;  %v2302_v11 = vpop.f32.mrb[19].mxu1 }
 0x179   : > { %v2430_v36 = vmax.f32 %v2246_v60, 1e-06  ;;  %v2250_v23 = vadd.f32 %v2249_v54, %v973_v7  ;;  %v2432_v12 = vmax.f32 %v2299_v47, 1e-06  ;;  %v2303_v45 = vadd.f32 %v2302_v11, %v975_v14 }
 0x17a   : > { %v2493_v61 = vmul.f32 %v2429_v43, %v2429_v43  ;;  %v2445_v44 = vmax.f32 %v2248_v34, 1e-06  ;;  %v2495_v46 = vmul.f32 %v2431_v22, %v2431_v22  ;;  %v2447_v51 = vmax.f32 %v2301_v38, 1e-06  ;;  %v4663_v1 = vld [vmem:[#allocation2 + $0x2] sm:$0x1] }
 0x17b   : > { %v2494_v50 = vmul.f32 %v2430_v36, %v2430_v36  ;;  %v2446_v52 = vmax.f32 %v2250_v23, 1e-06  ;;  %v2496_v53 = vmul.f32 %v2432_v12, %v2432_v12  ;;  %v2448_v58 = vmax.f32 %v2303_v45, 1e-06  ;;  %v4665_v2 = vld [vmem:[#allocation2] sm:$0x1]  ;;  %2973 = vrot.lane.b32.xlu1 %v4663_v1, %s3667_s9 }
 0x17c   : > { %v2557_v49 = vmul.f32 %v2493_v61, %v2429_v43  ;;  %v2509_v56 = vmul.f32 %v2445_v44, %v2445_v44  ;;  %v2559_v21 = vmul.f32 %v2495_v46, %v2431_v22  ;;  %v2511_v63 = vmul.f32 %v2447_v51, %v2447_v51  ;;  %2959 = vrot.lane.b32.xlu0 %v4665_v2, %s3667_s9  ;;  %v4671_v23 = vld [vmem:[#allocation2 + $0x3] sm:$0x1]  ;;  %v4673_v11 = vld [vmem:[#allocation2 + $0x1] sm:$0x1] }
 0x17d   : > { %v2558_v24 = vmul.f32 %v2494_v50, %v2430_v36  ;;  %v2510_v0 = vmul.f32 %v2446_v52, %v2446_v52  ;;  %v2253_v3 = vpop.f32.mrb[20].mxu0  ;;  %v2560_v5 = vmul.f32 %v2496_v53, %v2432_v12  ;;  %v2512_v16 = vmul.f32 %v2448_v58, %v2448_v58  ;;  %v2306_v13 = vpop.f32.mrb[20].mxu1 }
 0x17e   : > { %v2573_v10 = vmul.f32 %v2509_v56, %v2445_v44  ;;  %v2255_v18 = vpop.f32.mrb[21].mxu0  ;;  %v2575_v60 = vmul.f32 %v2511_v63, %v2447_v51  ;;  %v2254_v19 = vadd.f32 %v2253_v3, %v972_v4  ;;  %v2307_v43 = vadd.f32 %v2306_v13, %v974_v6  ;;  %v2308_v47 = vpop.f32.mrb[21].mxu1  ;;  %v4693_v3 = vld [vmem:[#allocation2 + $0x4] sm:$0x1] }
 0x17f   : > { %v2574_v26 = vmul.f32 %v2510_v0, %v2446_v52  ;;  %v2257_v34 = vpop.f32.mrb[22].mxu0  ;;  %v2576_v54 = vmul.f32 %v2512_v16, %v2448_v58  ;;  %v2256_v22 = vadd.f32 %v2255_v18, %v973_v7  ;;  %v2309_v36 = vadd.f32 %v2308_v47, %v975_v14  ;;  %v2310_v38 = vpop.f32.mrb[22].mxu1  ;;  %2980 = vrot.lane.b32.xlu1 %v4671_v23, %s3667_s9 }
 0x180   : > { %v2763_v8 = vadd.f32 %v2573_v10, %v2557_v49  ;;  %v2259_v61 = vpop.f32.mrb[23].mxu0  ;;  %v2781_v12 = vadd.f32 %v2575_v60, %v2559_v21  ;;  %v2461_v45 = vmax.f32 %v2254_v19, 1e-06  ;;  %v2463_v46 = vmax.f32 %v2307_v43, 1e-06  ;;  %v2312_v50 = vpop.f32.mrb[23].mxu1  ;;  %2966 = vrot.lane.b32.xlu0 %v4673_v11, %s3667_s9 }
 0x181   : > { %v2772_v44 = vadd.f32 %v2574_v26, %v2558_v24  ;;  %v2790_v51 = vadd.f32 %v2576_v54, %v2560_v5  ;;  %v2462_v4 = vmax.f32 %v2256_v22, 1e-06  ;;  %v2464_v6 = vmax.f32 %v2309_v36, 1e-06  ;;  %v4699_v60 = vld [vmem:[#allocation2 + $0x7] sm:$0x1] }
 0x182   : > { %v2258_v52 = vadd.f32 %v2257_v34, %v1004_v15  ;;  %v2525_v7 = vmul.f32 %v2461_v45, %v2461_v45  ;;  %v2527_v14 = vmul.f32 %v2463_v46, %v2463_v46  ;;  %v2311_v49 = vadd.f32 %v2310_v38, %v1006_v20  ;;  %v4691_v15 = vld [vmem:[#allocation2 + $0x5] sm:$0x1]  ;;  %v4701_v26 = vld [vmem:[#allocation2 + $0x6] sm:$0x1] }
 0x183   : > { %v2260_v53 = vadd.f32 %v2259_v61, %v1005_v32  ;;  %v2526_v56 = vmul.f32 %v2462_v4, %v2462_v4  ;;  %v2528_v58 = vmul.f32 %v2464_v6, %v2464_v6  ;;  %v2313_v35 = vadd.f32 %v2312_v50, %v1007_v55  ;;  %2994 = vrot.lane.b32.xlu1 %v4691_v15, %s3667_s9 }
 0x184   : > { %v2477_v17 = vmax.f32 %v2258_v52, 1e-06  ;;  %v2589_v21 = vmul.f32 %v2525_v7, %v2461_v45  ;;  %v2591_v24 = vmul.f32 %v2527_v14, %v2463_v46  ;;  %v2479_v63 = vmax.f32 %v2311_v49, 1e-06  ;;  %2987 = vrot.lane.b32.xlu0 %v4693_v3, %s3667_s9 }
 0x185   : > { %v2478_v0 = vmax.f32 %v2260_v53, 1e-06  ;;  %v2590_v41 = vmul.f32 %v2526_v56, %v2462_v4  ;;  %v2592_v59 = vmul.f32 %v2528_v58, %v2464_v6  ;;  %v2480_v30 = vmax.f32 %v2313_v35, 1e-06 }
 0x186   : > { %v2541_v20 = vmul.f32 %v2477_v17, %v2477_v17  ;;  %v2764_v39 = vadd.f32 %v2763_v8, %v2589_v21  ;;  %v2782_v62 = vadd.f32 %v2781_v12, %v2591_v24  ;;  %v2543_v40 = vmul.f32 %v2479_v63, %v2479_v63 }
 0x187   : > { %v2542_v32 = vmul.f32 %v2478_v0, %v2478_v0  ;;  %v2773_v55 = vadd.f32 %v2772_v44, %v2590_v41  ;;  %v2791_v5 = vadd.f32 %v2790_v51, %v2592_v59  ;;  %v2544_v16 = vmul.f32 %v2480_v30, %v2480_v30  ;;  %3008 = vrot.lane.b32.xlu1 %v4699_v60, %s3667_s9 }
 0x188   : > { %v2605_v10 = vmul.f32 %v2541_v20, %v2477_v17  ;;  %v2607_v13 = vmul.f32 %v2543_v40, %v2479_v63  ;;  %3001 = vrot.lane.b32.xlu0 %v4701_v26, %s3667_s9  ;;  %v551_v58 = vrot.slane %v4584_v27, %v4499_v25  ;;  %v559_v21 = vrot.slane %v4584_v27, %v4502_v31 }
 0x189   : > { %v2606_v18 = vmul.f32 %v2542_v32, %v2478_v0  ;;  %v2608_v43 = vmul.f32 %v2544_v16, %v2480_v30  ;;  %v555_v24 = vrot.slane %v4584_v27, %v4505_v33  ;;  %v563_v41 = vrot.slane %v4584_v27, %v4508_v37 }
 0x18a   : > { %v2765_v19 = vadd.f32 %v2764_v39, %v2605_v10  ;;  %v2783_v47 = vadd.f32 %v2782_v62, %v2607_v13  ;;  %v697_v20 = vrot.slane %v4591_v42, %v4499_v25  ;;  %v592_v39 = vmul.f32 %v551_v58, %v4436_v29 }
 0x18b   : > { %v2774_v34 = vadd.f32 %v2773_v55, %v2606_v18  ;;  %v2792_v54 = vadd.f32 %v2791_v5, %v2608_v43  ;;  %v855_v62 = vrot.slane %v4598_v9, %v4499_v25  ;;  %v705_v40 = vrot.slane %v4591_v42, %v4502_v31 }
 0x18c   : > { %v2766_v8 = vrot.slane %v2765_v19, 4  ;;  %v2784_v22 = vrot.slane %v2783_v47, 4  ;;  %v594_v55 = vmul.f32 %v559_v21, %v4436_v29  ;;  %v863_v5 = vrot.slane %v4598_v9, %v4502_v31 }
 0x18d   : > { %v2775_v36 = vrot.slane %v2774_v34, 4  ;;  %v2793_v61 = vrot.slane %v2792_v54, 4  ;;  %v593_v27 = vmul.f32 %v555_v24, %v4436_v29  ;;  %v701_v16 = vrot.slane %v4591_v42, %v4505_v33 }
 0x18e   : > { %v2767_v38 = vadd.f32 %v2766_v8, %v2765_v19  ;;  %v2785_v12 = vadd.f32 %v2784_v22, %v2783_v47  ;;  %v859_v25 = vrot.slane %v4598_v9, %v4505_v33  ;;  %v595_v13 = vmul.f32 %v563_v41, %v4436_v29 }
 0x18f   : > { %v2776_v44 = vadd.f32 %v2775_v36, %v2774_v34  ;;  %v2794_v46 = vadd.f32 %v2793_v61, %v2792_v54  ;;  %v709_v19 = vrot.slane %v4591_v42, %v4508_v37  ;;  %v867_v31 = vrot.slane %v4598_v9, %v4508_v37 }
 0x190   : > { %v2768_v45 = vrot.slane %v2767_v38, 2  ;;  %v2786_v50 = vrot.slane %v2785_v12, 2  ;;  %v608_v43 = vmul.f32 0.0, %v551_v58  ;;  %v610_v47 = vmul.f32 0.0, %v559_v21 }
 0x191   : > { %v2777_v51 = vrot.slane %v2776_v44, 2  ;;  %v2795_v6 = vrot.slane %v2794_v46, 2  ;;  %v609_v34 = vmul.f32 0.0, %v555_v24  ;;  %v738_v54 = vsub.f32 %v697_v20, %v592_v39 }
 0x192   : > { %v2769_v4 = vadd.f32 %v2768_v45, %v2767_v38  ;;  %v2787_v52 = vadd.f32 %v2786_v50, %v2785_v12  ;;  %v896_v22 = vmul.f32 0.0, %v855_v62  ;;  %v611_v33 = vmul.f32 0.0, %v563_v41 }
 0x193   : > { %v2778_v7 = vadd.f32 %v2777_v51, %v2776_v44  ;;  %v2796_v49 = vadd.f32 %v2795_v6, %v2794_v46  ;;  %v740_v36 = vsub.f32 %v705_v40, %v594_v55  ;;  %v898_v29 = vmul.f32 0.0, %v863_v5 }
 0x194   : > { %v2770_v14 = vrot.slane %v2769_v4, 1  ;;  %v2788_v53 = vrot.slane %v2787_v52, 1  ;;  %v739_v38 = vsub.f32 %v701_v16, %v593_v27  ;;  %v897_v61 = vmul.f32 0.0, %v859_v25 }
 0x195   : > { %v2779_v56 = vrot.slane %v2778_v7, 1  ;;  %v2797_v35 = vrot.slane %v2796_v49, 1  ;;  %v741_v12 = vsub.f32 %v709_v19, %v595_v13  ;;  %v899_v44 = vmul.f32 0.0, %v867_v31 }
 0x196   : > { %v2771_v17 = vadd.f32 %v2770_v14, %v2769_v4  ;;  %v2789_v63 = vadd.f32 %v2788_v53, %v2787_v52  ;;  %v4743_v45 = vsub.f32 %v697_v20, %v608_v43  ;;  %v4745_v42 = vsub.f32 %v705_v40, %v610_v47 }
 0x197   : > { %v2780_v0 = vadd.f32 %v2779_v56, %v2778_v7  ;;  %v2798_v59 = vadd.f32 %v2797_v35, %v2796_v49  ;;  %v4747_v37 = vsub.f32 %v701_v16, %v609_v34  ;;  %v960_v9 = vsub.f32 %v738_v54, %v896_v22 }
 0x198   : > { %v4749_v46 = vsub.f32 %v709_v19, %v611_v33  ;;  %v4752_v50 = vmul.f32 %v855_v62, %v4464_v57  ;;  %v962_v51 = vsub.f32 %v740_v36, %v898_v29  ;;  %v961_v4 = vsub.f32 %v739_v38, %v897_v61 }
 0x199   : > { %v2900_v30 = vcombine.low %v2771_v17, %v2780_v0  ;;  %v2901_v32 = vcombine.low %v2789_v63, %v2798_v59  ;;  %v4755_v6 = vmul.f32 %v863_v5, %v4464_v57  ;;  %v4758_v52 = vmul.f32 %v859_v25, %v4464_v57 }
 0x19a   : > { %v963_v7 = vsub.f32 %v741_v12, %v899_v44  ;;  %v976_v14 = vsub.f32 %v4743_v45, %v896_v22  ;;  %v4762_v49 = vmul.f32 %v867_v31, %v4464_v57  ;;  %v978_v56 = vsub.f32 %v4745_v42, %v898_v29 }
 0x19b   : > { %v4727_v10 = vrot.slane %v2900_v30, %v4517_v48  ;;  %v4735_v18 = vrot.slane %v2901_v32, %v4517_v48  ;;  %v977_v58 = vsub.f32 %v4747_v37, %v897_v61  ;;  %v979_v24 = vsub.f32 %v4749_v46, %v899_v44 }
 0x19c   : > { %v1008_v63 = vsub.f32 %v4743_v45, %v4752_v50  ;;  %v1010_v57 = vsub.f32 %v4745_v42, %v4755_v6  ;;  %v1009_v30 = vsub.f32 %v4747_v37, %v4758_v52  ;;  %v1011_v5 = vsub.f32 %v4749_v46, %v4762_v49 }
 0x19d   : > { %v2932_v8 = vcombine.low %v4727_v10, %v4735_v18 }
 0x1a5   : > { %v2349_v53 = vpop.f32.mrb[24].mxu0  ;;  %v2402_v35 = vpop.f32.mrb[24].mxu1 }
 0x1a6   : > { %v2350_v17 = vadd.f32 %v2349_v53, %v960_v9  ;;  %v2351_v21 = vpop.f32.mrb[25].mxu0  ;;  %v2403_v0 = vadd.f32 %v2402_v35, %v962_v51  ;;  %v2404_v59 = vpop.f32.mrb[25].mxu1 }
 0x1a7   : > { %v2352_v41 = vadd.f32 %v2351_v21, %v961_v4  ;;  %v2353_v20 = vpop.f32.mrb[26].mxu0  ;;  %v2405_v62 = vadd.f32 %v2404_v59, %v963_v7  ;;  %v2406_v32 = vpop.f32.mrb[26].mxu1 }
 0x1a8   : > { %v2433_v39 = vmax.f32 %v2350_v17, 1e-06  ;;  %v2354_v40 = vadd.f32 %v2353_v20, %v976_v14  ;;  %v2355_v55 = vpop.f32.mrb[27].mxu0  ;;  %v2435_v27 = vmax.f32 %v2403_v0, 1e-06  ;;  %v2407_v25 = vadd.f32 %v2406_v32, %v978_v56  ;;  %v2408_v19 = vpop.f32.mrb[27].mxu1 }
 0x1a9   : > { %v2434_v16 = vmax.f32 %v2352_v41, 1e-06  ;;  %v2356_v13 = vadd.f32 %v2355_v55, %v977_v58  ;;  %v2436_v43 = vmax.f32 %v2405_v62, 1e-06  ;;  %v2409_v34 = vadd.f32 %v2408_v19, %v979_v24 }
 0x1aa   : > { %v2497_v31 = vmul.f32 %v2433_v39, %v2433_v39  ;;  %v2449_v47 = vmax.f32 %v2354_v40, 1e-06  ;;  %v2499_v54 = vmul.f32 %v2435_v27, %v2435_v27  ;;  %v2451_v33 = vmax.f32 %v2407_v25, 1e-06 }
 0x1ab   : > { %v2498_v22 = vmul.f32 %v2434_v16, %v2434_v16  ;;  %v2450_v36 = vmax.f32 %v2356_v13, 1e-06  ;;  %v2500_v38 = vmul.f32 %v2436_v43, %v2436_v43  ;;  %v2452_v12 = vmax.f32 %v2409_v34, 1e-06 }
 0x1ac   : > { %v2561_v29 = vmul.f32 %v2497_v31, %v2433_v39  ;;  %v2513_v61 = vmul.f32 %v2449_v47, %v2449_v47  ;;  %v2563_v44 = vmul.f32 %v2499_v54, %v2435_v27  ;;  %v2515_v42 = vmul.f32 %v2451_v33, %v2451_v33 }
 0x1ad   : > { %v2562_v45 = vmul.f32 %v2498_v22, %v2434_v16  ;;  %v2514_v37 = vmul.f32 %v2450_v36, %v2450_v36  ;;  %v2359_v9 = vpop.f32.mrb[28].mxu0  ;;  %v2564_v46 = vmul.f32 %v2500_v38, %v2436_v43  ;;  %v2516_v51 = vmul.f32 %v2452_v12, %v2452_v12  ;;  %v2412_v6 = vpop.f32.mrb[28].mxu1 }
 0x1ae   : > { %v2577_v50 = vmul.f32 %v2513_v61, %v2449_v47  ;;  %v2360_v4 = vadd.f32 %v2359_v9, %v976_v14  ;;  %v2361_v52 = vpop.f32.mrb[29].mxu0  ;;  %v2579_v7 = vmul.f32 %v2515_v42, %v2451_v33  ;;  %v2413_v53 = vadd.f32 %v2412_v6, %v978_v56  ;;  %v2414_v35 = vpop.f32.mrb[29].mxu1 }
 0x1af   : > { %v2578_v49 = vmul.f32 %v2514_v37, %v2450_v36  ;;  %v2362_v17 = vadd.f32 %v2361_v52, %v977_v58  ;;  %v2363_v21 = vpop.f32.mrb[30].mxu0  ;;  %v2580_v41 = vmul.f32 %v2516_v51, %v2452_v12  ;;  %v2415_v20 = vadd.f32 %v2414_v35, %v979_v24  ;;  %v2416_v39 = vpop.f32.mrb[30].mxu1 }
 0x1b0   : > { %v2799_v0 = vadd.f32 %v2577_v50, %v2561_v29  ;;  %v2465_v59 = vmax.f32 %v2360_v4, 1e-06  ;;  %v2365_v62 = vpop.f32.mrb[31].mxu0  ;;  %v2817_v40 = vadd.f32 %v2579_v7, %v2563_v44  ;;  %v2467_v55 = vmax.f32 %v2413_v53, 1e-06  ;;  %v2418_v16 = vpop.f32.mrb[31].mxu1 }
 0x1b1   : > { %v2808_v32 = vadd.f32 %v2578_v49, %v2562_v45  ;;  %v2466_v27 = vmax.f32 %v2362_v17, 1e-06  ;;  %v2826_v14 = vadd.f32 %v2580_v41, %v2564_v46  ;;  %v2468_v13 = vmax.f32 %v2415_v20, 1e-06 }
 0x1b2   : > { %v2529_v25 = vmul.f32 %v2465_v59, %v2465_v59  ;;  %v2364_v19 = vadd.f32 %v2363_v21, %v1008_v63  ;;  %v2531_v31 = vmul.f32 %v2467_v55, %v2467_v55  ;;  %v2417_v58 = vadd.f32 %v2416_v39, %v1010_v57 }
 0x1b3   : > { %v2530_v56 = vmul.f32 %v2466_v27, %v2466_v27  ;;  %v2366_v43 = vadd.f32 %v2365_v62, %v1009_v30  ;;  %v2532_v34 = vmul.f32 %v2468_v13, %v2468_v13  ;;  %v2419_v22 = vadd.f32 %v2418_v16, %v1011_v5 }
 0x1b4   : > { %v2593_v47 = vmul.f32 %v2529_v25, %v2465_v59  ;;  %v2481_v54 = vmax.f32 %v2364_v19, 1e-06  ;;  %v2595_v24 = vmul.f32 %v2531_v31, %v2467_v55  ;;  %v2483_v36 = vmax.f32 %v2417_v58, 1e-06 }
 0x1b5   : > { %v2594_v33 = vmul.f32 %v2530_v56, %v2466_v27  ;;  %v2482_v29 = vmax.f32 %v2366_v43, 1e-06  ;;  %v2596_v61 = vmul.f32 %v2532_v34, %v2468_v13  ;;  %v2484_v44 = vmax.f32 %v2419_v22, 1e-06 }
 0x1b6   : > { %v2800_v38 = vadd.f32 %v2799_v0, %v2593_v47  ;;  %v2545_v12 = vmul.f32 %v2481_v54, %v2481_v54  ;;  %v2818_v45 = vadd.f32 %v2817_v40, %v2595_v24  ;;  %v2547_v37 = vmul.f32 %v2483_v36, %v2483_v36 }
 0x1b7   : > { %v2809_v42 = vadd.f32 %v2808_v32, %v2594_v33  ;;  %v2546_v63 = vmul.f32 %v2482_v29, %v2482_v29  ;;  %v2827_v9 = vadd.f32 %v2826_v14, %v2596_v61  ;;  %v2548_v57 = vmul.f32 %v2484_v44, %v2484_v44 }
 0x1b8   : > { %v2609_v46 = vmul.f32 %v2545_v12, %v2481_v54  ;;  %v2611_v30 = vmul.f32 %v2547_v37, %v2483_v36  ;;  %v2940_v24 = vrot.slane %v2932_v8, %v4517_v48  ;;  %v3668_v37 = vmov 0.0|0.0  }
 0x1b9   : > { %v2610_v50 = vmul.f32 %v2546_v63, %v2482_v29  ;;  %v2612_v4 = vmul.f32 %v2548_v57, %v2484_v44  ;;  %v3074_v44 = vld [vmem:[%s4910_s3] sm:$0xff]  ;;  %3503 = vmatprep.subr.bf16.mxu0 %v3668_v37  ;;  %v3076_v63 = vld [vmem:[%s4910_s3 + $0x10] sm:$0xff] }
 0x1ba   : > { %v2801_v51 = vadd.f32 %v2800_v38, %v2609_v46  ;;  %v2819_v5 = vadd.f32 %v2818_v45, %v2611_v30  ;;  %v3075_v45 = vld [vmem:[%s4910_s3 + $0x8] sm:$0xff]  ;;  %v3078_v46 = vld [vmem:[%s4910_s3 + $0x20] sm:$0xff] }
 0x1bb   : > { %v2810_v6 = vadd.f32 %v2809_v42, %v2610_v50  ;;  %v2828_v7 = vadd.f32 %v2827_v9, %v2612_v4  ;;  %v3504_v42 = vpack.c.bf16 %v3075_v45, %v3074_v44  ;;  %v3077_v9 = vld [vmem:[%s4910_s3 + $0x18] sm:$0xff]  ;;  %v3079_v30 = vld [vmem:[%s4910_s3 + $0x28] sm:$0xff] }
 0x1bc   : > { %v2802_v52 = vrot.slane %v2801_v51, 4  ;;  %v2820_v49 = vrot.slane %v2819_v5, 4  ;;  %v3507_v57 = vpack.c.bf16 %v3077_v9, %v3076_v63  ;;  %v3510_v50 = vpack.c.bf16 %v3079_v30, %v3078_v46  ;;  %v3081_v4 = vld [vmem:[%s4910_s3 + $0x38] sm:$0xff] }
 0x1bd   : > { %v2811_v53 = vrot.slane %v2810_v6, 4  ;;  %v2829_v35 = vrot.slane %v2828_v7, 4  ;;  %3505 = vmatpush3.bf16.msra.mxu0 %v3504_v42 }
 0x1be   : > { %v2803_v17 = vadd.f32 %v2802_v52, %v2801_v51  ;;  %v2821_v21 = vadd.f32 %v2820_v49, %v2819_v5  ;;  %3506 = vmatprep.subr.bf16.mxu0 %v3668_v37  ;;  %v3080_v51 = vld [vmem:[%s4910_s3 + $0x30] sm:$0xff] }
 0x1bf   : > { %v2812_v0 = vadd.f32 %v2811_v53, %v2810_v6  ;;  %v2830_v59 = vadd.f32 %v2829_v35, %v2828_v7  ;;  %v3513_v5 = vpack.c.bf16 %v3081_v4, %v3080_v51 }
 0x1c0   : > { %v2804_v41 = vrot.slane %v2803_v17, 2  ;;  %v2822_v20 = vrot.slane %v2821_v21, 2 }
 0x1c1   : > { %v2813_v39 = vrot.slane %v2812_v0, 2  ;;  %v2831_v40 = vrot.slane %v2830_v59, 2  ;;  %3508 = vmatpush3.bf16.msra.mxu0 %v3507_v57 }
 0x1c2   : > { %v2805_v62 = vadd.f32 %v2804_v41, %v2803_v17  ;;  %v2823_v32 = vadd.f32 %v2822_v20, %v2821_v21  ;;  %3509 = vmatprep.subr.bf16.mxu0 %v3668_v37 }
 0x1c3   : > { %v2814_v55 = vadd.f32 %v2813_v39, %v2812_v0  ;;  %v2832_v16 = vadd.f32 %v2831_v40, %v2830_v59 }
 0x1c4   : > { %v2806_v27 = vrot.slane %v2805_v62, 1  ;;  %v2824_v14 = vrot.slane %v2823_v32, 1 }
 0x1c5   : > { %v2815_v25 = vrot.slane %v2814_v55, 1  ;;  %v2833_v19 = vrot.slane %v2832_v16, 1  ;;  %3511 = vmatpush3.bf16.msra.mxu0 %v3510_v50 }
 0x1c6   : > { %v2807_v13 = vadd.f32 %v2806_v27, %v2805_v62  ;;  %v2825_v31 = vadd.f32 %v2824_v14, %v2823_v32  ;;  %3512 = vmatprep.subr.bf16.mxu0 %v3668_v37 }
 0x1c7   : > { %v2816_v56 = vadd.f32 %v2815_v25, %v2814_v55  ;;  %v2834_v58 = vadd.f32 %v2833_v19, %v2832_v16 }
 0x1c9   : > { %v2902_v43 = vcombine.low %v2807_v13, %v2816_v56  ;;  %v2903_v47 = vcombine.low %v2825_v31, %v2834_v58  ;;  %3514 = vmatpush3.bf16.msra.mxu0 %v3513_v5 }
 0x1cb   : > { %v2924_v34 = vrot.slane %v2902_v43, %v4517_v48  ;;  %v2931_v54 = vrot.slane %v2903_v47, %v4517_v48 }
 0x1cd   : > { %v2933_v22 = vcombine.low %v2924_v34, %v2931_v54 }
 0x1cf   : > { %v2947_v33 = vrot.slane %v2933_v22, %v4517_v48 }
 0x1d1   : > { %v2948_v36 = vcombine.low %v2940_v24, %v2947_v33 }
 0x1d3   : > { %2954 = vst [vmem:[#allocation2 + $0x8] sm:$0xff] %v2948_v36 }
 0x1da   : > { %v4782_v29 = vld [vmem:[#allocation2 + $0x9] sm:$0x1]  ;;  %v3012_v38 = vld [vmem:[#allocation2 + $0x8] sm:$0x1]  ;;  %v4787_v61 = vld [vmem:[#allocation2 + $0xb] sm:$0x1] }
 0x1db   : > { %3022 = vrot.lane.b32.xlu1 %v4782_v29, %s3667_s9  ;;  %3015 = vrot.lane.b32.xlu0 %v3012_v38, %s3667_s9  ;;  %v4789_v12 = vld [vmem:[#allocation2 + $0xa] sm:$0x1]  ;;  %v4795_v48 = vld [vmem:[#allocation2 + $0xd] sm:$0x1]  ;;  %v4797_v10 = vld [vmem:[#allocation2 + $0xc] sm:$0x1] }
 0x1dc   : > { %v4803_v18 = vld [vmem:[#allocation2 + $0xf] sm:$0x1]  ;;  %v4805_v8 = vld [vmem:[#allocation2 + $0xe] sm:$0x1] }
 0x1df   : > { %3036 = vrot.lane.b32.xlu1 %v4787_v61, %s3667_s9  ;;  %3029 = vrot.lane.b32.xlu0 %v4789_v12, %s3667_s9 }
 0x1e3   : > { %3050 = vrot.lane.b32.xlu1 %v4795_v48, %s3667_s9  ;;  %3043 = vrot.lane.b32.xlu0 %v4797_v10, %s3667_s9 }
 0x1e7   : > { %3064 = vrot.lane.b32.xlu1 %v4803_v18, %s3667_s9  ;;  %3057 = vrot.lane.b32.xlu0 %v4805_v8, %s3667_s9 }
 0x1ed   : > { %v2974_v17 = vpop.permute.xlu1 %2973 }
 0x1ee   : > { %v2960_v6 = vpop.permute.xlu0 %2959 }
 0x1ef   : > { %v2962_v52 = vadd.f32 %v2960_v6, %v4665_v2 }
 0x1f1   : > { %v2964_v28 = vadd.f32 %v4673_v11, %v2962_v52  ;;  %v2981_v0 = vpop.permute.xlu1 %2980 }
 0x1f2   : > { %v2967_v7 = vpop.permute.xlu0 %2966 }
 0x1f3   : > { %v2969_v49 = vadd.f32 %v2967_v7, %v2964_v28 }
 0x1f5   : > { %v2971_v53 = vadd.f32 %v4663_v1, %v2969_v49  ;;  %v2995_v40 = vpop.permute.xlu1 %2994 }
 0x1f6   : > { %v2988_v20 = vpop.permute.xlu0 %2987 }
 0x1f7   : > { %v2976_v35 = vadd.f32 %v2974_v17, %v2971_v53 }
 0x1f9   : > { %v2978_v21 = vadd.f32 %v4671_v23, %v2976_v35  ;;  %v3009_v27 = vpop.permute.xlu1 %3008 }
 0x1fa   : > { %v3002_v32 = vpop.permute.xlu0 %3001 }
 0x1fb   : > { %v2983_v41 = vadd.f32 %v2981_v0, %v2978_v21 }
 0x1fd   : > { %v2985_v59 = vadd.f32 %v4693_v3, %v2983_v41 }
 0x1ff   : > { %v2990_v39 = vadd.f32 %v2988_v20, %v2985_v59 }
 0x201   : > { %v2992_v62 = vadd.f32 %v4691_v15, %v2990_v39 }
 0x203   : > { %v2997_v2 = vadd.f32 %v2995_v40, %v2992_v62 }
 0x205   : > { %v2999_v11 = vadd.f32 %v4701_v26, %v2997_v2 }
 0x207   : > { %v3004_v55 = vadd.f32 %v3002_v32, %v2999_v11 }
 0x209   : > { %v3006_v1 = vadd.f32 %v4699_v60, %v3004_v55 }
 0x20b   : > { %v3011_v16 = vadd.f32 %v3009_v27, %v3006_v1 }
 0x20d   : > { %v3013_v14 = vadd.f32 %v3012_v38, %v3011_v16 }
 0x24d   : > { %v3016_v23 = vpop.permute.xlu0 %3015  ;;  %v3023_v3 = vpop.permute.xlu1 %3022 }
 0x24e   : > { %v3018_v25 = vadd.f32 %v3016_v23, %v3013_v14 }
 0x250   : > { %v3020_v13 = vadd.f32 %v4782_v29, %v3018_v25 }
 0x251   : > { %v3030_v15 = vpop.permute.xlu0 %3029  ;;  %v3037_v26 = vpop.permute.xlu1 %3036 }
 0x252   : > { %v3025_v19 = vadd.f32 %v3023_v3, %v3020_v13 }
 0x254   : > { %v3027_v31 = vadd.f32 %v4789_v12, %v3025_v19 }
 0x255   : > { %v3044_v60 = vpop.permute.xlu0 %3043  ;;  %v3051_v22 = vpop.permute.xlu1 %3050 }
 0x256   : > { %v3032_v56 = vadd.f32 %v3030_v15, %v3027_v31 }
 0x258   : > { %v3034_v58 = vadd.f32 %v4787_v61, %v3032_v56 }
 0x259   : > { %v3058_v36 = vpop.permute.xlu0 %3057  ;;  %v3065_v12 = vpop.permute.xlu1 %3064 }
 0x25a   : > { %v3039_v43 = vadd.f32 %v3037_v26, %v3034_v58 }
 0x25c   : > { %v3041_v47 = vadd.f32 %v4797_v10, %v3039_v43 }
 0x25e   : > { %v3046_v34 = vadd.f32 %v3044_v60, %v3041_v47 }
 0x260   : > { %v3048_v54 = vadd.f32 %v4795_v48, %v3046_v34 }
 0x262   : > { %v3053_v24 = vadd.f32 %v3051_v22, %v3048_v54 }
 0x264   : > { %v3055_v33 = vadd.f32 %v4805_v8, %v3053_v24  ;;  %v3082_v8 = vld [vmem:[%s4911_s4] sm:$0x1] }
 0x266   : > { %v3060_v29 = vadd.f32 %v3058_v36, %v3055_v33 }
 0x268   : > { %v3062_v38 = vadd.f32 %v4803_v18, %v3060_v29 }
 0x26a   : > { %v3067_v61 = vadd.f32 %v3065_v12, %v3062_v38 }
 0x26c   : > { %v3068_v44 = vmul.f32 0.0009765625, %v3067_v61 }
 0x26e   : > { %3581 = vlog2.f32 %v3068_v44 }
 0x278   : > { %v3582_v45 = vpop.eup %3581 }
 0x279   : > { %v3070_v10 = vmul.f32 0.6931472, %v3582_v45 }
 0x27b   : > { %v3071_v42 = vmul.f32 0.33333334, %v3070_v10 }
 0x27d   : > { %v3072_v37 = vmul.f32 1.442695, %v3071_v42 }
 0x27f   : > { %3583 = vpow2.f32 %v3072_v37 }
 0x289   : > { %v3584_v48 = vpop.eup %3583 }
 0x28a   : > { %3501 = vmatmul.mubr.msk.f32.vlgmr.msra.gmra.mrb[32].mxu0 %vm1990_vm0, %v3584_v48 }
 0x35d   : > { %v3152_v18 = vpop.f32.mrb[32].mxu0 }
 0x35e   : > { %v3153_v63 = vadd.f32 %v3152_v18, %v3082_v8  ;;  %v3502_v9 = vpop.f32.mrb[33].mxu0 }
 0x360   : > { %3157 = vst.msk [vmem:[%s253_s15] sm:$0x1] %vm3156_vm4, %v3153_v63 }
 0x361   : > { %3598 = shalt.err (!%p3595_p5)
}
 0x362   : > { %s3599_s9 = scalar_lea.hbm %s4860_s24, 16  ;;  %s3603_s12 = scalar_lea.hbm %s4912_s5, 32 }
 0x363   : > { %p3600_p6 = scmp.ne.s32.totalorder %s4860_s24, %s3599_s9  ;;  %p3604_p10 = scmp.lt.u32.totalorder %s4860_s24, %s4912_s5 }
 0x364   : > { %p3605_p11 = scmp.lt.u32.totalorder %s3603_s12, %s3599_s9  ;;  %p3607_p13 = scmp.lt.u32.totalorder %s3599_s9, %s4860_s24 }
 0x365   : > { %p3601_p7 = pnand %p3600_p6, %p3741_p4 }
 0x366   : > { %p3606_p12 = por %p3605_p11, %p3604_p10 }
 0x367   : > { %p3602_p9 = pneg %p3601_p7 }
 0x368   : > { %p3608_p0 = por %p3607_p13, %p3606_p12 }
 0x36a   : > { %p3609_p1 = pnand %p3608_p0, %p3602_p9 }
 0x36c   : > { %3612 = shalt.err (!%p3609_p1)
}
 0x36d   : > { %3515 = dma.vmem_to_hbm [thread:$0]  (%p3741_p4), %s4862_s14, 16, %s4860_s24, %s3159_s25  }
 0x36e PF: > { %p3521_p2 = scmp.ge.s32.totalorder %s3663_s23, 2  ;;  %s3183_s15 = sand.u32 1, %s3643_s18  }
 0x36f   : > { %s3184_s16 = scalar_lea.sflag [#allocation4], %s3183_s15 }
 0x370   : > { %p3518_p3 = pnand %p3521_p2, %p3748_p8 }
 0x372   : > { %3638 = dma.done.wait (!%p3518_p3), %s3184_s16, 16  }
 0x373   : > { %3640 = vsyncadd (!%p3518_p3), %s3184_s16, 4294967280  ;;  %s18_s23 = sadd.s32 1, %s3663_s23   ;;  %s4915_s18 = smov %s3647_s19 }
 0x374   : > { %p15_p5 = scmp.ge.s32.totalorder %s18_s23, 4   ;;  %s4916_s19 = smov %s3651_s20 }
 0x375   : > { %s4917_s20 = smov %s3754_s6  ;;  %s4918_s21 = smov %s3659_s22 }
 0x376   : > { %s4919_s22 = smov %s4921_s26  ;;  %17 = sbr.rel (!%p15_p5) target bundleno = 4 (0x4), region = 88 }
 0x37d   :  { %3188 = vsyncpa [#allocation4], 1 }
 0x37e   :  { %3190 = vsyncpa [#allocation4 + $0x1], 1 }

</bundles_post_ra>
